<compile_context>
chip_gen: v5e
topology: v5e:2x2
jax: 0.10.0
libtpu: 0.0.40
codegen_flags: <defaults>
</compile_context>

<pallas_src>
import jax
import jax.numpy as jnp
from jax.experimental import pallas as pl
from jax.experimental.pallas import tpu as pltpu

BN_EPS = 1e-5
HIDDEN = 400
HIDDEN_PAD = 512          # 400 rounded up to a multiple of 128 lanes


def _round_up(x, m):
    return (x + m - 1) // m * m


def fnn_mlp_kernel(x_ref,
                   w1_ref, b1_ref,
                   w2_ref, b2_ref,
                   w3_ref, b3_ref,
                   wo_ref, bo_ref,
                   out_ref):
    """3x (Linear with folded BN + ReLU) + output Linear as a lane reduce."""
    h = x_ref[...]                                                       # (TB, K0) bf16

    h = jnp.dot(h, w1_ref[...], preferred_element_type=jnp.float32) + b1_ref[...]
    h = jnp.maximum(h, 0.0).astype(jnp.bfloat16)

    h = jnp.dot(h, w2_ref[...], preferred_element_type=jnp.float32) + b2_ref[...]
    h = jnp.maximum(h, 0.0).astype(jnp.bfloat16)

    h = jnp.dot(h, w3_ref[...], preferred_element_type=jnp.float32) + b3_ref[...]
    h = jnp.maximum(h, 0.0)                                              # (TB, H) f32

    # Output Linear(H, 1): an N=1 MXU matmul wastes the array and pays push/pop
    # latency on the epilogue -> broadcast-multiply + lane reduce instead.
    out_ref[...] = (jnp.sum(h * wo_ref[...].astype(jnp.float32),
                            axis=-1, keepdims=True) + bo_ref[...])


def init_params(key, field_dims, embed_dim, num_layers=3, hidden=HIDDEN):
    """Deterministic synthetic parameter init (shapes match the PyTorch module)."""
    embed_output_dim = len(field_dims) * embed_dim
    keys = jax.random.split(key, 2 + 2 * num_layers + 2)
    ki = iter(keys)

    params = {}
    params["emb_table"] = 0.05 * jax.random.normal(
        next(ki), (sum(field_dims), embed_dim), jnp.float32)
    params["offsets"] = jnp.asarray(
        [0] + list(jnp.cumsum(jnp.asarray(field_dims))[:-1]), jnp.int32)

    in_dim = embed_output_dim
    layers = []
    for _ in range(num_layers):
        w = jax.random.normal(next(ki), (in_dim, hidden), jnp.float32) / jnp.sqrt(in_dim)
        b = 0.01 * jax.random.normal(next(ki), (1, hidden), jnp.float32)
        # BatchNorm1d parameters at PyTorch defaults (eval mode)
        layers.append(dict(w=w, b=b,
                           gamma=jnp.ones((1, hidden), jnp.float32),
                           beta=jnp.zeros((1, hidden), jnp.float32),
                           mean=jnp.zeros((1, hidden), jnp.float32),
                           var=jnp.ones((1, hidden), jnp.float32)))
        in_dim = hidden
    params["layers"] = layers

    params["w_out"] = jax.random.normal(next(ki), (in_dim, 1), jnp.float32) / jnp.sqrt(in_dim)
    params["b_out"] = 0.01 * jax.random.normal(next(ki), (1, 1), jnp.float32)
    return params


def prepare_inference_params(params, hidden_pad=HIDDEN_PAD):
    """One-time prep: fold eval-mode BN into Linear, zero-pad hidden to a
    128-multiple, cast weights / embedding table to bf16 (biases stay f32)."""
    layers = params["layers"]
    assert len(layers) == 3, "kernel is specialized for num_layers=3"

    prep = {
        "emb_table": params["emb_table"].astype(jnp.bfloat16),
        "offsets": params["offsets"],
    }
    ws, bs = [], []
    for li, layer in enumerate(layers):
        scale = layer["gamma"] / jnp.sqrt(layer["var"] + BN_EPS)     # (1, H)
        shift = layer["beta"] - layer["mean"] * scale                # (1, H)
        w = layer["w"] * scale                                       # (in, H)
        b = layer["b"] * scale + shift                               # (1, H)
        h = w.shape[1]
        w = jnp.pad(w, ((0, 0), (0, hidden_pad - h)))                # pad out cols
        b = jnp.pad(b, ((0, 0), (0, hidden_pad - h)))
        if li > 0:                                                   # pad in rows
            w = jnp.pad(w, ((0, hidden_pad - w.shape[0]), (0, 0)))
        ws.append(w.astype(jnp.bfloat16))
        bs.append(b.astype(jnp.float32))
    prep["ws"] = ws
    prep["bs"] = bs

    wo = jnp.pad(params["w_out"], ((0, hidden_pad - params["w_out"].shape[0]), (0, 0)))
    prep["wo_row"] = wo.reshape(1, hidden_pad).astype(jnp.bfloat16)  # (1, Hpad)
    prep["bo"] = params["b_out"].astype(jnp.float32)                 # (1, 1)
    return prep


def fnn_forward(x, prep, *, max_batch_tile=256):
    """x: (B, F) int32 categorical indices -> (B, 1) float32 predictions."""
    B = x.shape[0]

    # --- glue: FeaturesEmbedding(concat=True) --------------------------------
    # TODO(synk): at serving batch sizes, fuse this gather into the kernel via
    # PrefetchScalarGridSpec (indices in SMEM) to avoid the x_emb HBM round trip.
    idx = x + prep["offsets"][None, :]                     # (B, F)
    x_emb = jnp.take(prep["emb_table"], idx, axis=0)       # (B, F, D) bf16
    x_emb = x_emb.reshape(B, -1)                           # (B, K0)
    K0 = x_emb.shape[1]
    H = HIDDEN_PAD

    # --- batch tiling: weights VMEM-resident across grid steps ---------------
    tb = min(max_batch_tile, _round_up(B, 8))
    n_tiles = pl.cdiv(B, tb)
    b_pad = n_tiles * tb
    if b_pad != B:
        x_emb = jnp.pad(x_emb, ((0, b_pad - B), (0, 0)))
    grid = (n_tiles,)

    const = lambda i: (0, 0)
    in_specs = [
        pl.BlockSpec((tb, K0), lambda i: (i, 0)),          # activations: tiled over batch
        pl.BlockSpec((K0, H), const), pl.BlockSpec((1, H), const),
        pl.BlockSpec((H, H), const),  pl.BlockSpec((1, H), const),
        pl.BlockSpec((H, H), const),  pl.BlockSpec((1, H), const),
        pl.BlockSpec((1, H), const),  pl.BlockSpec((1, 1), const),
    ]
    out_spec = pl.BlockSpec((tb, 1), lambda i: (i, 0))

    flops = 2 * b_pad * (K0 * H + 2 * H * H + H)
    bytes_accessed = (
        int(x_emb.size) * 2
        + sum(int(w.size) * 2 for w in prep["ws"])
        + sum(int(b.size) * 4 for b in prep["bs"])
        + int(prep["wo_row"].size) * 2 + 4
        + b_pad * 4)

    out = pl.pallas_call(
        fnn_mlp_kernel,
        out_shape=jax.ShapeDtypeStruct((b_pad, 1), jnp.float32),
        grid=grid,
        in_specs=in_specs,
        out_specs=out_spec,
        compiler_params=pltpu.CompilerParams(
            dimension_semantics=("parallel",),
            vmem_limit_bytes=32 * 1024 * 1024),
        cost_estimate=pl.CostEstimate(
            flops=int(flops), transcendentals=0, bytes_accessed=int(bytes_accessed)),
    )(x_emb,
      prep["ws"][0], prep["bs"][0],
      prep["ws"][1], prep["bs"][1],
      prep["ws"][2], prep["bs"][2],
      prep["wo_row"], prep["bo"])

    return out[:B]


def fnn_reference(x, params):
    """Pure-JAX f32 reference (original module semantics, eval mode)."""
    B = x.shape[0]
    idx = x + params["offsets"][None, :]
    h = jnp.take(params["emb_table"], idx, axis=0).reshape(B, -1)
    for layer in params["layers"]:
        h = h @ layer["w"] + layer["b"]
        h = (h - layer["mean"]) / jnp.sqrt(layer["var"] + BN_EPS) * layer["gamma"] + layer["beta"]
        h = jnp.maximum(h, 0.0)
        # Dropout(p=0.5) is identity in eval mode.
    return h @ params["w_out"] + params["b_out"]


if __name__ == "__main__":
    field_dims = [10, 20, 30, 40]   # 4 categorical fields
    embed_dim = 16                  # embed_output_dim = 64
    batch = 8

    key = jax.random.PRNGKey(0)
    k_param, k_x = jax.random.split(key)
    params = init_params(k_param, field_dims, embed_dim, num_layers=3, hidden=HIDDEN)
    prep = prepare_inference_params(params)

    # one random index per field, within that field's cardinality
    cols = []
    for f, dim in enumerate(field_dims):
        cols.append(jax.random.randint(jax.random.fold_in(k_x, f), (batch,), 0, dim))
    x = jnp.stack(cols, axis=1).astype(jnp.int32)   # (B, F)

    fwd = jax.jit(fnn_forward)
    out = fwd(x, prep)
    jax.block_until_ready(out)

    ref = fnn_reference(x, params)
    assert out.shape == (batch, 1)
    # bf16 weights/activations in the kernel vs the f32 reference -> small slack.
    max_diff = float(jnp.max(jnp.abs(out - ref)))
    assert jnp.allclose(out, ref, atol=1e-2, rtol=1e-2), f"mismatch vs reference: {max_diff}"

    print("KERNEL_OK")
</pallas_src>

<mosaic_0001>
module attributes {stable_mosaic.version = 11 : i64} {
  func.func @fnn_mlp_kernel(%arg0: i32, %arg1: memref<8x64xbf16, #tpu.memory_space<vmem>>, %arg2: memref<64x512xbf16, #tpu.memory_space<vmem>>, %arg3: memref<1x512xf32, #tpu.memory_space<vmem>>, %arg4: memref<512x512xbf16, #tpu.memory_space<vmem>>, %arg5: memref<1x512xf32, #tpu.memory_space<vmem>>, %arg6: memref<512x512xbf16, #tpu.memory_space<vmem>>, %arg7: memref<1x512xf32, #tpu.memory_space<vmem>>, %arg8: memref<1x512xbf16, #tpu.memory_space<vmem>>, %arg9: memref<1x1xf32, #tpu.memory_space<vmem>>, %arg10: memref<8x1xf32, #tpu.memory_space<vmem>>) attributes {dimension_semantics = [#tpu.dimension_semantics<parallel>], iteration_bounds = array<i64: 1>, scalar_prefetch = 0 : i64, scratch_operands = 0 : i64, tpu.core_type = #tpu.core_type<tc>, window_params = [{transform_indices = @transform_0, window_bounds = array<i64: 8, 64>}, {pipeline_mode = #tpu.pipeline_mode<synchronous>, transform_indices = @transform_1, window_bounds = array<i64: 64, 512>}, {pipeline_mode = #tpu.pipeline_mode<synchronous>, transform_indices = @transform_2, window_bounds = array<i64: 1, 512>}, {pipeline_mode = #tpu.pipeline_mode<synchronous>, transform_indices = @transform_3, window_bounds = array<i64: 512, 512>}, {pipeline_mode = #tpu.pipeline_mode<synchronous>, transform_indices = @transform_4, window_bounds = array<i64: 1, 512>}, {pipeline_mode = #tpu.pipeline_mode<synchronous>, transform_indices = @transform_5, window_bounds = array<i64: 512, 512>}, {pipeline_mode = #tpu.pipeline_mode<synchronous>, transform_indices = @transform_6, window_bounds = array<i64: 1, 512>}, {pipeline_mode = #tpu.pipeline_mode<synchronous>, transform_indices = @transform_7, window_bounds = array<i64: 1, 512>}, {pipeline_mode = #tpu.pipeline_mode<synchronous>, transform_indices = @transform_8, window_bounds = array<i64: 1, 1>}, {transform_indices = @transform_9, window_bounds = array<i64: 8, 1>}]} {
    %c0 = arith.constant 0 : index
    %c0_0 = arith.constant 0 : index
    %0 = vector.load %arg1[%c0, %c0_0] : memref<8x64xbf16, #tpu.memory_space<vmem>>, vector<8x64xbf16>
    %c0_1 = arith.constant 0 : index
    %c0_2 = arith.constant 0 : index
    %1 = vector.load %arg2[%c0_1, %c0_2] : memref<64x512xbf16, #tpu.memory_space<vmem>>, vector<64x512xbf16>
    %cst = arith.constant dense<0.000000e+00> : vector<8x512xf32>
    %2 = tpu.matmul %0, %1, %cst {dimension_numbers = #tpu.dot_dimension_numbers<[1], [0], [0], [1], [0, 0, 1, 1], [], []>} : vector<8x64xbf16>, vector<64x512xbf16>, vector<8x512xf32> -> vector<8x512xf32>
    %c0_3 = arith.constant 0 : index
    %c0_4 = arith.constant 0 : index
    %3 = vector.load %arg3[%c0_3, %c0_4] : memref<1x512xf32, #tpu.memory_space<vmem>>, vector<1x512xf32>
    %4 = vector.broadcast %3 : vector<1x512xf32> to vector<8x512xf32>
    %5 = arith.addf %2, %4 : vector<8x512xf32>
    %cst_5 = arith.constant 0.000000e+00 : f32
    %6 = vector.broadcast %cst_5 : f32 to vector<8x512xf32>
    %7 = arith.maximumf %5, %6 : vector<8x512xf32>
    %8 = arith.truncf %7 : vector<8x512xf32> to vector<8x512xbf16>
    %c0_6 = arith.constant 0 : index
    %c0_7 = arith.constant 0 : index
    %9 = vector.load %arg4[%c0_6, %c0_7] : memref<512x512xbf16, #tpu.memory_space<vmem>>, vector<512x512xbf16>
    %cst_8 = arith.constant dense<0.000000e+00> : vector<8x512xf32>
    %10 = tpu.matmul %8, %9, %cst_8 {dimension_numbers = #tpu.dot_dimension_numbers<[1], [0], [0], [1], [0, 0, 1, 1], [], []>} : vector<8x512xbf16>, vector<512x512xbf16>, vector<8x512xf32> -> vector<8x512xf32>
    %c0_9 = arith.constant 0 : index
    %c0_10 = arith.constant 0 : index
    %11 = vector.load %arg5[%c0_9, %c0_10] : memref<1x512xf32, #tpu.memory_space<vmem>>, vector<1x512xf32>
    %12 = vector.broadcast %11 : vector<1x512xf32> to vector<8x512xf32>
    %13 = arith.addf %10, %12 : vector<8x512xf32>
    %cst_11 = arith.constant 0.000000e+00 : f32
    %14 = vector.broadcast %cst_11 : f32 to vector<8x512xf32>
    %15 = arith.maximumf %13, %14 : vector<8x512xf32>
    %16 = arith.truncf %15 : vector<8x512xf32> to vector<8x512xbf16>
    %c0_12 = arith.constant 0 : index
    %c0_13 = arith.constant 0 : index
    %17 = vector.load %arg6[%c0_12, %c0_13] : memref<512x512xbf16, #tpu.memory_space<vmem>>, vector<512x512xbf16>
    %cst_14 = arith.constant dense<0.000000e+00> : vector<8x512xf32>
    %18 = tpu.matmul %16, %17, %cst_14 {dimension_numbers = #tpu.dot_dimension_numbers<[1], [0], [0], [1], [0, 0, 1, 1], [], []>} : vector<8x512xbf16>, vector<512x512xbf16>, vector<8x512xf32> -> vector<8x512xf32>
    %c0_15 = arith.constant 0 : index
    %c0_16 = arith.constant 0 : index
    %19 = vector.load %arg7[%c0_15, %c0_16] : memref<1x512xf32, #tpu.memory_space<vmem>>, vector<1x512xf32>
    %20 = vector.broadcast %19 : vector<1x512xf32> to vector<8x512xf32>
    %21 = arith.addf %18, %20 : vector<8x512xf32>
    %cst_17 = arith.constant 0.000000e+00 : f32
    %22 = vector.broadcast %cst_17 : f32 to vector<8x512xf32>
    %23 = arith.maximumf %21, %22 : vector<8x512xf32>
    %c0_18 = arith.constant 0 : index
    %c0_19 = arith.constant 0 : index
    %24 = vector.load %arg8[%c0_18, %c0_19] : memref<1x512xbf16, #tpu.memory_space<vmem>>, vector<1x512xbf16>
    %25 = arith.extf %24 : vector<1x512xbf16> to vector<1x512xf32>
    %26 = vector.broadcast %25 : vector<1x512xf32> to vector<8x512xf32>
    %27 = arith.mulf %23, %26 : vector<8x512xf32>
    %cst_20 = arith.constant dense<0.000000e+00> : vector<8xf32>
    %28 = vector.multi_reduction <add>, %27, %cst_20 [1] : vector<8x512xf32> to vector<8xf32>
    %29 = vector.shape_cast %28 : vector<8xf32> to vector<8x1xf32>
    %c0_21 = arith.constant 0 : index
    %c0_22 = arith.constant 0 : index
    %30 = vector.load %arg9[%c0_21, %c0_22] : memref<1x1xf32, #tpu.memory_space<vmem>>, vector<1x1xf32>
    %31 = vector.broadcast %30 : vector<1x1xf32> to vector<8x1xf32>
    %32 = arith.addf %29, %31 : vector<8x1xf32>
    %c0_23 = arith.constant 0 : index
    %c0_24 = arith.constant 0 : index
    %33 = vector.load %arg10[%c0_23, %c0_24] : memref<8x1xf32, #tpu.memory_space<vmem>>, vector<8x1xf32>
    tpu.vector_store %arg10[%c0_23, %c0_24], %32 {strides = array<i32>} : memref<8x1xf32, #tpu.memory_space<vmem>>, vector<8x1xf32>,
    return
  }
  func.func @transform_0(%arg0: i32) -> (i32, i32) {
    %c0_i32 = arith.constant 0 : i32
    %c0_i32_0 = arith.constant 0 : i32
    return %arg0, %c0_i32 : i32, i32
  }
  func.func @transform_1(%arg0: i32) -> (i32, i32) {
    %c0_i32 = arith.constant 0 : i32
    %c0_i32_0 = arith.constant 0 : i32
    %c0_i32_1 = arith.constant 0 : i32
    return %c0_i32, %c0_i32_0 : i32, i32
  }
  func.func @transform_2(%arg0: i32) -> (i32, i32) {
    %c0_i32 = arith.constant 0 : i32
    %c0_i32_0 = arith.constant 0 : i32
    %c0_i32_1 = arith.constant 0 : i32
    return %c0_i32, %c0_i32_0 : i32, i32
  }
  func.func @transform_3(%arg0: i32) -> (i32, i32) {
    %c0_i32 = arith.constant 0 : i32
    %c0_i32_0 = arith.constant 0 : i32
    %c0_i32_1 = arith.constant 0 : i32
    return %c0_i32, %c0_i32_0 : i32, i32
  }
  func.func @transform_4(%arg0: i32) -> (i32, i32) {
    %c0_i32 = arith.constant 0 : i32
    %c0_i32_0 = arith.constant 0 : i32
    %c0_i32_1 = arith.constant 0 : i32
    return %c0_i32, %c0_i32_0 : i32, i32
  }
  func.func @transform_5(%arg0: i32) -> (i32, i32) {
    %c0_i32 = arith.constant 0 : i32
    %c0_i32_0 = arith.constant 0 : i32
    %c0_i32_1 = arith.constant 0 : i32
    return %c0_i32, %c0_i32_0 : i32, i32
  }
  func.func @transform_6(%arg0: i32) -> (i32, i32) {
    %c0_i32 = arith.constant 0 : i32
    %c0_i32_0 = arith.constant 0 : i32
    %c0_i32_1 = arith.constant 0 : i32
    return %c0_i32, %c0_i32_0 : i32, i32
  }
  func.func @transform_7(%arg0: i32) -> (i32, i32) {
    %c0_i32 = arith.constant 0 : i32
    %c0_i32_0 = arith.constant 0 : i32
    %c0_i32_1 = arith.constant 0 : i32
    return %c0_i32, %c0_i32_0 : i32, i32
  }
  func.func @transform_8(%arg0: i32) -> (i32, i32) {
    %c0_i32 = arith.constant 0 : i32
    %c0_i32_0 = arith.constant 0 : i32
    %c0_i32_1 = arith.constant 0 : i32
    return %c0_i32, %c0_i32_0 : i32, i32
  }
  func.func @transform_9(%arg0: i32) -> (i32, i32) {
    %c0_i32 = arith.constant 0 : i32
    %c0_i32_0 = arith.constant 0 : i32
    return %arg0, %c0_i32 : i32, i32
  }
}

</mosaic_0001>

<bundles_post_ra>
// kernel: fnn_forward.1
= control target key start
LH: loop header
LB: loop body
LE: loop exit
PB: predicated region body
PF: predicated region fallthrough
CT: control target
= control target key end

     0   :  { %s3921_s0 = inlined_call_operand.vmem [shape: bf16[8,64], index: 0, kind: input, shape index: {}]   ;;  %s3922_s1 = inlined_call_operand.vmem [shape: bf16[64,512], index: 1, kind: input, shape index: {}]   ;;  %s3923_s2 = inlined_call_operand.vmem [shape: f32[1,512], index: 2, kind: input, shape index: {}]   ;;  %s3924_s3 = inlined_call_operand.hbm [shape: bf16[512,512], index: 3, kind: input, shape index: {}]   ;;  %s3925_s4 = inlined_call_operand.vmem [shape: f32[1,512], index: 4, kind: input, shape index: {}]   ;;  %s3926_s5 = inlined_call_operand.hbm [shape: bf16[512,512], index: 5, kind: input, shape index: {}]   ;;  %s3927_s6 = inlined_call_operand.vmem [shape: f32[1,512], index: 6, kind: input, shape index: {}]   ;;  %s3928_s7 = inlined_call_operand.vmem [shape: bf16[1,512], index: 7, kind: input, shape index: {}]   ;;  %s3929_s8 = inlined_call_operand.<no memory space> [shape: f32[1,1], index: 8, kind: input, shape index: {}]   ;;  %s3930_s9 = inlined_call_operand.vmem [shape: f32[8,1], index: 9, kind: output, shape index: {}]  }
   0x1   :  { %v14_v0 = vstv %s3929_s8 }
   0x2   :  { %15 = vst [vmem:[#allocation2] sm:$0x1] %v14_v0 }
   0x3   :  { %16 = vsyncpa [#allocation4], 0  ;;  %s28_s13 = sshll.u32 %s3924_s3, 4  ;;  %s29_s13 = int_to_ptr.hbm [resolvable:$true] %s28_s13 }
   0x4   :  { %17 = vsyncpa [#allocation6], 0  ;;  %s3680_s14 = smov [#allocation3]   ;;  %s43_s18 = sshll.u32 %s3926_s5, 4  ;;  %s44_s18 = int_to_ptr.hbm [resolvable:$true] %s43_s18 }
   0x5   :  { %s30_s15 = sshll.u32 %s3680_s14, 4  ;;  %s3681_s19 = smov 256   ;;  %s31_s15 = int_to_ptr.vmem [resolvable:$true] %s30_s15 }
   0x6   :  { %s3682_s20 = smov 16   ;;  %s3683_s8 = smov [#allocation5]  }
   0x7   :  { %36 = dma.hbm_to_vmem [thread:$0]  %s29_s13, 16384, %s31_s15, [#allocation4], %s3681_s19, %s3681_s19, %s3682_s20  }
   0x8   :  { %s45_s21 = sshll.u32 %s3683_s8, 4  ;;  %s46_s21 = int_to_ptr.vmem [resolvable:$true] %s45_s21 }
   0x9   :  { %51 = dma.hbm_to_vmem [thread:$0]  %s44_s18, 16384, %s46_s21, [#allocation6], %s3681_s19, %s3681_s19, %s3682_s20  }
   0xa   :  { %3676 = dma.done.wait [#allocation4], 16384  }
   0xb   :  { %3677 = vsyncadd [#allocation4], 4294950912 }
   0xc   :  { %3678 = dma.done.wait [#allocation6], 16384  }
   0xd   :  { %3679 = vsyncadd [#allocation6], 4294950912  ;;  %v2309_v1 = vld [vmem:[%s3922_s1 + $0x60] sm:$0xf]  ;;  %v3365_v2 = vld [vmem:[%s3922_s1 + $0x6c] sm:$0xf0] }
   0xe   :  { %v3363_v3 = vld [vmem:[%s3922_s1 + $0x64] sm:$0xf]  ;;  %v2310_v4 = vor.u32 %v3365_v2, %v2309_v1  ;;  %v2311_v5 = vld [vmem:[%s3922_s1 + $0x70] sm:$0xf0]  ;;  %v2317_v6 = vld [vmem:[%s3922_s1 + $0x68] sm:$0xf] }
   0xf   :  { %v3366_v7 = vld [vmem:[%s3922_s1 + $0x74] sm:$0xf0]  ;;  %v2314_v8 = vor.u32 %v3363_v3, %v2311_v5  ;;  %v3364_v10 = vld [vmem:[%s3922_s1 + $0x6c] sm:$0xf]  ;;  %v2319_v11 = vld [vmem:[%s3922_s1 + $0x78] sm:$0xf0] }
  0x10   :  { %v2318_v9 = vor.u32 %v3366_v7, %v2317_v6  ;;  %v2293_v12 = vld [vmem:[%s3922_s1 + $0x40] sm:$0xf]  ;;  %182 = vmatpush.bf16.msra.mxu0 %v2310_v4  ;;  %v2322_v13 = vor.u32 %v3364_v10, %v2319_v11  ;;  %v3361_v14 = vld [vmem:[%s3922_s1 + $0x4c] sm:$0xf0]  ;;  %v3359_v15 = vld [vmem:[%s3922_s1 + $0x44] sm:$0xf] }
  0x11   :  { %v2295_v16 = vld [vmem:[%s3922_s1 + $0x50] sm:$0xf0]  ;;  %195 = vmatpush.bf16.msra.mxu1 %v2314_v8  ;;  %v2294_v17 = vor.u32 %v3361_v14, %v2293_v12  ;;  %v2301_v19 = vld [vmem:[%s3922_s1 + $0x48] sm:$0xf]  ;;  %v3362_v20 = vld [vmem:[%s3922_s1 + $0x54] sm:$0xf0] }
  0x12   :  { %208 = vmatpush.bf16.msra.mxu2 %v2318_v9  ;;  %v2298_v18 = vor.u32 %v3359_v15, %v2295_v16  ;;  %v3360_v21 = vld [vmem:[%s3922_s1 + $0x4c] sm:$0xf]  ;;  %221 = vmatpush.bf16.msra.mxu3 %v2322_v13  ;;  %v2302_v22 = vor.u32 %v3362_v20, %v2301_v19  ;;  %v2303_v23 = vld [vmem:[%s3922_s1 + $0x58] sm:$0xf0]  ;;  %v2277_v24 = vld [vmem:[%s3922_s1 + $0x20] sm:$0xf] }
  0x13   :  { %v3357_v25 = vld [vmem:[%s3922_s1 + $0x2c] sm:$0xf0]  ;;  %v2306_v26 = vor.u32 %v3360_v21, %v2303_v23  ;;  %v3355_v27 = vld [vmem:[%s3922_s1 + $0x24] sm:$0xf]  ;;  %v2279_v28 = vld [vmem:[%s3922_s1 + $0x30] sm:$0xf0] }
  0x14   :  { %v2285_v29 = vld [vmem:[%s3922_s1 + $0x28] sm:$0xf]  ;;  %183 = vmatpush.bf16.msra.mxu0 %v2294_v17  ;;  %v2278_v30 = vor.u32 %v3357_v25, %v2277_v24  ;;  %v3358_v31 = vld [vmem:[%s3922_s1 + $0x34] sm:$0xf0]  ;;  %v3356_v32 = vld [vmem:[%s3922_s1 + $0x2c] sm:$0xf]  ;;  %v2282_v34 = vor.u32 %v3355_v27, %v2279_v28 }
  0x15   :  { %v2287_v33 = vld [vmem:[%s3922_s1 + $0x38] sm:$0xf0]  ;;  %196 = vmatpush.bf16.msra.mxu1 %v2298_v18  ;;  %v2286_v35 = vor.u32 %v3358_v31, %v2285_v29  ;;  %v2261_v36 = vld [vmem:[%s3922_s1] sm:$0xf]  ;;  %v3353_v37 = vld [vmem:[%s3922_s1 + $0xc] sm:$0xf0] }
  0x16   :  { %209 = vmatpush.bf16.msra.mxu2 %v2302_v22  ;;  %v3351_v38 = vld [vmem:[%s3922_s1 + $0x4] sm:$0xf]  ;;  %222 = vmatpush.bf16.msra.mxu3 %v2306_v26  ;;  %v2290_v39 = vor.u32 %v3356_v32, %v2287_v33  ;;  %v2263_v40 = vld [vmem:[%s3922_s1 + $0x10] sm:$0xf0]  ;;  %v2269_v41 = vld [vmem:[%s3922_s1 + $0x8] sm:$0xf]  ;;  %v2262_v45 = vor.u32 %v3353_v37, %v2261_v36 }
  0x17   :  { %v3354_v42 = vld [vmem:[%s3922_s1 + $0x14] sm:$0xf0]  ;;  %v3352_v43 = vld [vmem:[%s3922_s1 + $0xc] sm:$0xf]  ;;  %v2271_v44 = vld [vmem:[%s3922_s1 + $0x18] sm:$0xf0]  ;;  %v2266_v49 = vor.u32 %v3351_v38, %v2263_v40 }
  0x18   :  { %184 = vmatpush.bf16.msra.mxu0 %v2278_v30  ;;  %v2441_v46 = vld [vmem:[#allocation3 + $0xe0] sm:$0xf]  ;;  %v3397_v47 = vld [vmem:[#allocation3 + $0xec] sm:$0xf0]  ;;  %v2270_v50 = vor.u32 %v3354_v42, %v2269_v41  ;;  %vm174_vm0 = vcmask 523264   ;;  %v2274_v52 = vor.u32 %v3352_v43, %v2271_v44  ;;  %vm2251_vm1 = vcmask 7168  }
  0x19   :  { %v2569_v48 = vld [vmem:[#allocation3 + $0x1e0] sm:$0xf]  ;;  %197 = vmatpush.bf16.msra.mxu1 %v2282_v34  ;;  %v3429_v51 = vld [vmem:[#allocation3 + $0x1ec] sm:$0xf0]  ;;  %v2442_v53 = vor.u32 %v3397_v47, %v2441_v46 }
  0x1a   :  { %210 = vmatpush.bf16.msra.mxu2 %v2286_v35  ;;  %223 = vmatpush.bf16.msra.mxu3 %v2290_v39  ;;  %v2425_v54 = vld [vmem:[#allocation3 + $0xc0] sm:$0xf]  ;;  %v3393_v55 = vld [vmem:[#allocation3 + $0xcc] sm:$0xf0]  ;;  %v2570_v57 = vor.u32 %v3429_v51, %v2569_v48 }
  0x1b   :  { %v2697_v56 = vld [vmem:[#allocation3 + $0x2e0] sm:$0xf]  ;;  %v3461_v58 = vld [vmem:[#allocation3 + $0x2ec] sm:$0xf0]  ;;  %v2426_v1 = vor.u32 %v3393_v55, %v2425_v54 }
  0x1c   :  { %v2825_v59 = vld [vmem:[#allocation3 + $0x3e0] sm:$0xf]  ;;  %v3493_v60 = vld [vmem:[#allocation3 + $0x3ec] sm:$0xf0]  ;;  %185 = vmatpush.bf16.msra.mxu0 %v2262_v45  ;;  %v2698_v0 = vor.u32 %v3461_v58, %v2697_v56 }
  0x1d   :  { %v67_v61 = vld [vmem:[%s3921_s0] sm:$0xf]  ;;  %v3425_v63 = vld [vmem:[#allocation3 + $0x1cc] sm:$0xf0]  ;;  %198 = vmatpush.bf16.msra.mxu1 %v2266_v49  ;;  %v2826_v2 = vor.u32 %v3493_v60, %v2825_v59 }
  0x1e   :  { %v2553_v62 = vld [vmem:[#allocation3 + $0x1c0] sm:$0xf]  ;;  %211 = vmatpush.bf16.msra.mxu2 %v2270_v50  ;;  %224 = vmatpush.bf16.msra.mxu3 %v2274_v52  ;;  %v3457_v5 = vld [vmem:[#allocation3 + $0x2cc] sm:$0xf0] }
  0x1f   :  { %v2409_v3 = vld [vmem:[#allocation3 + $0xa0] sm:$0xf]  ;;  %2323 = vmatmul.msk.bf16.vlgmr.msra.gmra.mxu0 %vm174_vm0, %v67_v61  ;;  %v2554_v6 = vor.u32 %v3425_v63, %v2553_v62  ;;  %v3389_v7 = vld [vmem:[#allocation3 + $0xac] sm:$0xf0] }
  0x20   :  { %1016 = vmatpush.bf16.msrb.mxu0 %v2442_v53  ;;  %v2681_v4 = vld [vmem:[#allocation3 + $0x2c0] sm:$0xf]  ;;  %v3489_v9 = vld [vmem:[#allocation3 + $0x3cc] sm:$0xf0]  ;;  %2324 = vmatmul.msk.bf16.vlgmr.msra.gmra.mxu1 %vm174_vm0, %v67_v61  ;;  %v2410_v13 = vor.u32 %v3389_v7, %v2409_v3 }
  0x21   :  { %1029 = vmatpush.bf16.msrb.mxu1 %v2570_v57  ;;  %v2809_v8 = vld [vmem:[#allocation3 + $0x3c0] sm:$0xf]  ;;  %2325 = vmatmul.msk.bf16.vlgmr.msra.gmra.mxu2 %vm174_vm0, %v67_v61  ;;  %v3421_v11 = vld [vmem:[#allocation3 + $0x1ac] sm:$0xf0]  ;;  %v2682_v12 = vor.u32 %v3457_v5, %v2681_v4 }
  0x22   :  { %v2537_v10 = vld [vmem:[#allocation3 + $0x1a0] sm:$0xf]  ;;  %2326 = vmatmul.msk.bf16.vlgmr.msra.gmra.mxu3 %vm174_vm0, %v67_v61  ;;  %1042 = vmatpush.bf16.msrb.mxu2 %v2698_v0  ;;  %v2810_v14 = vor.u32 %v3489_v9, %v2809_v8  ;;  %v3453_v17 = vld [vmem:[#allocation3 + $0x2ac] sm:$0xf0]  ;;  %v3395_v8 = vld [vmem:[#allocation3 + $0xe4] sm:$0xf] }
  0x23   :  { %1055 = vmatpush.bf16.msrb.mxu3 %v2826_v2  ;;  %v2393_v15 = vld [vmem:[#allocation3 + $0x80] sm:$0xf]  ;;  %v2538_v18 = vor.u32 %v3421_v11, %v2537_v10  ;;  %v3385_v19 = vld [vmem:[#allocation3 + $0x8c] sm:$0xf0]  ;;  %v2443_v9 = vld [vmem:[#allocation3 + $0xf0] sm:$0xf0] }
  0x24   :  { %1017 = vmatpush.bf16.msrb.mxu0 %v2426_v1  ;;  %v2665_v16 = vld [vmem:[#allocation3 + $0x2a0] sm:$0xf]  ;;  %v3485_v21 = vld [vmem:[#allocation3 + $0x3ac] sm:$0xf0]  ;;  %v2394_v25 = vor.u32 %v3385_v19, %v2393_v15  ;;  %v3427_v10 = vld [vmem:[#allocation3 + $0x1e4] sm:$0xf] }
  0x25   :  { %1030 = vmatpush.bf16.msrb.mxu1 %v2554_v6  ;;  %v2793_v20 = vld [vmem:[#allocation3 + $0x3a0] sm:$0xf]  ;;  %v3417_v23 = vld [vmem:[#allocation3 + $0x18c] sm:$0xf0]  ;;  %v2666_v24 = vor.u32 %v3453_v17, %v2665_v16  ;;  %v2571_v11 = vld [vmem:[#allocation3 + $0x1f0] sm:$0xf0] }
  0x26   :  { %v2521_v22 = vld [vmem:[#allocation3 + $0x180] sm:$0xf]  ;;  %1043 = vmatpush.bf16.msrb.mxu2 %v2682_v12  ;;  %v2794_v26 = vor.u32 %v3485_v21, %v2793_v20  ;;  %v3449_v29 = vld [vmem:[#allocation3 + $0x28c] sm:$0xf0]  ;;  %v3391_v15 = vld [vmem:[#allocation3 + $0xc4] sm:$0xf]  ;;  %v2446_v20 = vor.u32 %v3395_v8, %v2443_v9 }
  0x27   :  { %1056 = vmatpush.bf16.msrb.mxu3 %v2810_v14  ;;  %v2377_v27 = vld [vmem:[#allocation3 + $0x60] sm:$0xf]  ;;  %v2522_v30 = vor.u32 %v3417_v23, %v2521_v22  ;;  %v3381_v31 = vld [vmem:[#allocation3 + $0x6c] sm:$0xf0]  ;;  %v3459_v22 = vld [vmem:[#allocation3 + $0x2e4] sm:$0xf] }
  0x28   :  { %1018 = vmatpush.bf16.msrb.mxu0 %v2410_v13  ;;  %v2649_v28 = vld [vmem:[#allocation3 + $0x280] sm:$0xf]  ;;  %v3481_v33 = vld [vmem:[#allocation3 + $0x38c] sm:$0xf0]  ;;  %v2378_v37 = vor.u32 %v3381_v31, %v2377_v27  ;;  %v2699_v23 = vld [vmem:[#allocation3 + $0x2f0] sm:$0xf0] }
  0x29   :  { %1031 = vmatpush.bf16.msrb.mxu1 %v2538_v18  ;;  %v2777_v32 = vld [vmem:[#allocation3 + $0x380] sm:$0xf]  ;;  %v3413_v35 = vld [vmem:[#allocation3 + $0x16c] sm:$0xf0]  ;;  %v2650_v36 = vor.u32 %v3449_v29, %v2649_v28  ;;  %v2827_v27 = vld [vmem:[#allocation3 + $0x3f0] sm:$0xf0] }
  0x2a   :  { %v2505_v34 = vld [vmem:[#allocation3 + $0x160] sm:$0xf]  ;;  %1044 = vmatpush.bf16.msrb.mxu2 %v2666_v24  ;;  %v2778_v38 = vor.u32 %v3481_v33, %v2777_v32  ;;  %v3445_v41 = vld [vmem:[#allocation3 + $0x26c] sm:$0xf0]  ;;  %v2574_v24 = vor.u32 %v3427_v10, %v2571_v11  ;;  %v3423_v28 = vld [vmem:[#allocation3 + $0x1c4] sm:$0xf]  ;;  %v2702_v32 = vor.u32 %v3459_v22, %v2699_v23 }
  0x2b   :  { %1057 = vmatpush.bf16.msrb.mxu3 %v2794_v26  ;;  %v2361_v39 = vld [vmem:[#allocation3 + $0x40] sm:$0xf]  ;;  %v2506_v42 = vor.u32 %v3413_v35, %v2505_v34  ;;  %v3377_v43 = vld [vmem:[#allocation3 + $0x4c] sm:$0xf0]  ;;  %v3491_v26 = vld [vmem:[#allocation3 + $0x3e4] sm:$0xf] }
  0x2c   :  { %1019 = vmatpush.bf16.msrb.mxu0 %v2394_v25  ;;  %v2633_v40 = vld [vmem:[#allocation3 + $0x260] sm:$0xf]  ;;  %v3477_v45 = vld [vmem:[#allocation3 + $0x36c] sm:$0xf0]  ;;  %v2362_v49 = vor.u32 %v3377_v43, %v2361_v39  ;;  %v2427_v25 = vld [vmem:[#allocation3 + $0xd0] sm:$0xf0]  ;;  %v2830_v35 = vor.u32 %v3491_v26, %v2827_v27 }
  0x2d   :  { %1032 = vmatpush.bf16.msrb.mxu1 %v2522_v30  ;;  %v2761_v44 = vld [vmem:[#allocation3 + $0x360] sm:$0xf]  ;;  %v3409_v47 = vld [vmem:[#allocation3 + $0x14c] sm:$0xf0]  ;;  %v2634_v48 = vor.u32 %v3445_v41, %v2633_v40  ;;  %v2555_v29 = vld [vmem:[#allocation3 + $0x1d0] sm:$0xf0]  ;;  %v2430_v34 = vor.u32 %v3391_v15, %v2427_v25 }
  0x2e   :  { %v2489_v46 = vld [vmem:[#allocation3 + $0x140] sm:$0xf]  ;;  %1045 = vmatpush.bf16.msrb.mxu2 %v2650_v36  ;;  %v2762_v50 = vor.u32 %v3477_v45, %v2761_v44  ;;  %v3441_v53 = vld [vmem:[#allocation3 + $0x24c] sm:$0xf0]  ;;  %v3387_v33 = vld [vmem:[#allocation3 + $0xa4] sm:$0xf] }
  0x2f   :  { %1058 = vmatpush.bf16.msrb.mxu3 %v2778_v38  ;;  %v2345_v51 = vld [vmem:[#allocation3 + $0x20] sm:$0xf]  ;;  %v2490_v54 = vor.u32 %v3409_v47, %v2489_v46  ;;  %v3373_v55 = vld [vmem:[#allocation3 + $0x2c] sm:$0xf0]  ;;  %v3455_v36 = vld [vmem:[#allocation3 + $0x2c4] sm:$0xf]  ;;  %v2558_v38 = vor.u32 %v3423_v28, %v2555_v29 }
  0x30   :  { %1020 = vmatpush.bf16.msrb.mxu0 %v2378_v37  ;;  %v2617_v52 = vld [vmem:[#allocation3 + $0x240] sm:$0xf]  ;;  %v3473_v57 = vld [vmem:[#allocation3 + $0x34c] sm:$0xf0]  ;;  %v2346_v62 = vor.u32 %v3373_v55, %v2345_v51  ;;  %v2683_v37 = vld [vmem:[#allocation3 + $0x2d0] sm:$0xf0] }
  0x31   :  { %1033 = vmatpush.bf16.msrb.mxu1 %v2506_v42  ;;  %v2745_v56 = vld [vmem:[#allocation3 + $0x340] sm:$0xf]  ;;  %v3405_v59 = vld [vmem:[#allocation3 + $0x12c] sm:$0xf0]  ;;  %v2618_v60 = vor.u32 %v3441_v53, %v2617_v52  ;;  %v2411_v39 = vld [vmem:[#allocation3 + $0xb0] sm:$0xf0]  ;;  %v2686_v44 = vor.u32 %v3455_v36, %v2683_v37 }
  0x32   :  { %v2473_v58 = vld [vmem:[#allocation3 + $0x120] sm:$0xf]  ;;  %1046 = vmatpush.bf16.msrb.mxu2 %v2634_v48  ;;  %v2746_v63 = vor.u32 %v3473_v57, %v2745_v56  ;;  %v3369_v0 = vld [vmem:[#allocation3 + $0xc] sm:$0xf0]  ;;  %v3487_v40 = vld [vmem:[#allocation3 + $0x3c4] sm:$0xf]  ;;  %v2414_v45 = vor.u32 %v3387_v33, %v2411_v39 }
  0x33   :  { %v2329_v61 = vld [vmem:[#allocation3] sm:$0xf]  ;;  %1059 = vmatpush.bf16.msrb.mxu3 %v2762_v50  ;;  %v3437_v2 = vld [vmem:[#allocation3 + $0x22c] sm:$0xf0]  ;;  %v2474_v3 = vor.u32 %v3405_v59, %v2473_v58  ;;  %v2811_v41 = vld [vmem:[#allocation3 + $0x3d0] sm:$0xf0] }
  0x34   :  { %1021 = vmatpush.bf16.msrb.mxu0 %v2362_v49  ;;  %v2601_v1 = vld [vmem:[#allocation3 + $0x220] sm:$0xf]  ;;  %v3469_v6 = vld [vmem:[#allocation3 + $0x32c] sm:$0xf0]  ;;  %v2330_v13 = vor.u32 %v3369_v0, %v2329_v61  ;;  %v3419_v42 = vld [vmem:[#allocation3 + $0x1a4] sm:$0xf]  ;;  %v2814_v46 = vor.u32 %v3487_v40, %v2811_v41 }
  0x35   :  { %1034 = vmatpush.bf16.msrb.mxu1 %v2490_v54  ;;  %v2457_v4 = vld [vmem:[#allocation3 + $0x100] sm:$0xf]  ;;  %v3401_v7 = vld [vmem:[#allocation3 + $0x10c] sm:$0xf0]  ;;  %v2602_v12 = vor.u32 %v3437_v2, %v2601_v1  ;;  %v2539_v43 = vld [vmem:[#allocation3 + $0x1b0] sm:$0xf0] }
  0x36   :  { %v2729_v5 = vld [vmem:[#allocation3 + $0x320] sm:$0xf]  ;;  %1047 = vmatpush.bf16.msrb.mxu2 %v2618_v60  ;;  %v3433_v17 = vld [vmem:[#allocation3 + $0x20c] sm:$0xf0]  ;;  %v2458_v19 = vor.u32 %v3401_v7, %v2457_v4  ;;  %v3383_v47 = vld [vmem:[#allocation3 + $0x84] sm:$0xf]  ;;  %v2542_v50 = vor.u32 %v3419_v42, %v2539_v43 }
  0x37   :  { %1060 = vmatpush.bf16.msrb.mxu3 %v2746_v63  ;;  %v2730_v14 = vor.u32 %v3469_v6, %v2729_v5  ;;  %v2585_v16 = vld [vmem:[#allocation3 + $0x200] sm:$0xf]  ;;  %v3465_v21 = vld [vmem:[#allocation3 + $0x30c] sm:$0xf0]  ;;  %v3451_v48 = vld [vmem:[#allocation3 + $0x2a4] sm:$0xf] }
  0x38   :  { %1022 = vmatpush.bf16.msrb.mxu0 %v2346_v62  ;;  %v2713_v18 = vld [vmem:[#allocation3 + $0x300] sm:$0xf]  ;;  %v2586_v30 = vor.u32 %v3433_v17, %v2585_v16  ;;  %v2667_v49 = vld [vmem:[#allocation3 + $0x2b0] sm:$0xf0]  ;;  %v3483_v52 = vld [vmem:[#allocation3 + $0x3a4] sm:$0xf] }
  0x39   :  { %1035 = vmatpush.bf16.msrb.mxu1 %v2474_v3  ;;  %v2714_v31 = vor.u32 %v3465_v21, %v2713_v18  ;;  %v2395_v51 = vld [vmem:[#allocation3 + $0x90] sm:$0xf0]  ;;  %v3415_v54 = vld [vmem:[#allocation3 + $0x184] sm:$0xf]  ;;  %v2670_v56 = vor.u32 %v3451_v48, %v2667_v49 }
  0x3a   :  { %1048 = vmatpush.bf16.msrb.mxu2 %v2602_v12  ;;  %v2795_v53 = vld [vmem:[#allocation3 + $0x3b0] sm:$0xf0]  ;;  %v2398_v57 = vor.u32 %v3383_v47, %v2395_v51  ;;  %v3379_v59 = vld [vmem:[#allocation3 + $0x64] sm:$0xf] }
  0x3b   :  { %1061 = vmatpush.bf16.msrb.mxu3 %v2730_v14  ;;  %v2523_v55 = vld [vmem:[#allocation3 + $0x190] sm:$0xf0]  ;;  %v2798_v58 = vor.u32 %v3483_v52, %v2795_v53  ;;  %v3447_v60 = vld [vmem:[#allocation3 + $0x284] sm:$0xf] }
  0x3c   :  { %1023 = vmatpush.bf16.msrb.mxu0 %v2330_v13  ;;  %v2651_v61 = vld [vmem:[#allocation3 + $0x290] sm:$0xf0]  ;;  %v2526_v62 = vor.u32 %v3415_v54, %v2523_v55  ;;  %v3479_v0 = vld [vmem:[#allocation3 + $0x384] sm:$0xf] }
  0x3d   :  { %1036 = vmatpush.bf16.msrb.mxu1 %v2458_v19  ;;  %v2379_v63 = vld [vmem:[#allocation3 + $0x70] sm:$0xf0]  ;;  %v3411_v2 = vld [vmem:[#allocation3 + $0x164] sm:$0xf]  ;;  %v2654_v4 = vor.u32 %v3447_v60, %v2651_v61  ;;  %v3430_v60 = vld [vmem:[#allocation3 + $0x1f4] sm:$0xf0] }
  0x3e   :  { %1049 = vmatpush.bf16.msrb.mxu2 %v2586_v30  ;;  %v2779_v1 = vld [vmem:[#allocation3 + $0x390] sm:$0xf0]  ;;  %v2382_v5 = vor.u32 %v3379_v59, %v2379_v63  ;;  %v3375_v8 = vld [vmem:[#allocation3 + $0x44] sm:$0xf]  ;;  %v2577_v59 = vld [vmem:[#allocation3 + $0x1e8] sm:$0xf] }
  0x3f   :  { %1062 = vmatpush.bf16.msrb.mxu3 %v2714_v31  ;;  %v2507_v3 = vld [vmem:[#allocation3 + $0x170] sm:$0xf0]  ;;  %v2782_v6 = vor.u32 %v3479_v0, %v2779_v1  ;;  %v3407_v10 = vld [vmem:[#allocation3 + $0x144] sm:$0xf] }
  0x40   :  { %1068 = vmatpush.bf16.msra.mxu0 %v2446_v20  ;;  %v2510_v7 = vor.u32 %v3411_v2, %v2507_v3  ;;  %v2363_v9 = vld [vmem:[#allocation3 + $0x50] sm:$0xf0]  ;;  %v3443_v14 = vld [vmem:[#allocation3 + $0x264] sm:$0xf]  ;;  %v2578_v3 = vor.u32 %v3430_v60, %v2577_v59 }
  0x41   :  { %1081 = vmatpush.bf16.msra.mxu1 %v2574_v24  ;;  %v2491_v11 = vld [vmem:[#allocation3 + $0x150] sm:$0xf0]  ;;  %v2366_v12 = vor.u32 %v3375_v8, %v2363_v9  ;;  %v3475_v16 = vld [vmem:[#allocation3 + $0x364] sm:$0xf]  ;;  %v3426_v8 = vld [vmem:[#allocation3 + $0x1d4] sm:$0xf0] }
  0x42   :  { %1094 = vmatpush.bf16.msra.mxu2 %v2702_v32  ;;  %v2494_v13 = vor.u32 %v3407_v10, %v2491_v11  ;;  %v2635_v15 = vld [vmem:[#allocation3 + $0x270] sm:$0xf0]  ;;  %v3371_v20 = vld [vmem:[#allocation3 + $0x24] sm:$0xf] }
  0x43   :  { %1107 = vmatpush.bf16.msra.mxu3 %v2830_v35  ;;  %v2638_v17 = vor.u32 %v3443_v14, %v2635_v15  ;;  %v2763_v18 = vld [vmem:[#allocation3 + $0x370] sm:$0xf0]  ;;  %v3403_v23 = vld [vmem:[#allocation3 + $0x124] sm:$0xf]  ;;  %v2705_v14 = vld [vmem:[#allocation3 + $0x2e8] sm:$0xf] }
  0x44   :  { %1069 = vmatpush.bf16.msra.mxu0 %v2430_v34  ;;  %v2766_v19 = vor.u32 %v3475_v16, %v2763_v18  ;;  %v2347_v21 = vld [vmem:[#allocation3 + $0x30] sm:$0xf0]  ;;  %v3439_v26 = vld [vmem:[#allocation3 + $0x244] sm:$0xf]  ;;  %v3462_v15 = vld [vmem:[#allocation3 + $0x2f4] sm:$0xf0] }
  0x45   :  { %1082 = vmatpush.bf16.msra.mxu1 %v2558_v38  ;;  %v2350_v22 = vor.u32 %v3371_v20, %v2347_v21  ;;  %v2475_v24 = vld [vmem:[#allocation3 + $0x130] sm:$0xf0]  ;;  %v3471_v28 = vld [vmem:[#allocation3 + $0x344] sm:$0xf]  ;;  %v2833_v16 = vld [vmem:[#allocation3 + $0x3e8] sm:$0xf] }
  0x46   :  { %1095 = vmatpush.bf16.msra.mxu2 %v2686_v44  ;;  %v2478_v25 = vor.u32 %v3403_v23, %v2475_v24  ;;  %v2619_v27 = vld [vmem:[#allocation3 + $0x250] sm:$0xf0]  ;;  %v3367_v32 = vld [vmem:[#allocation3 + $0x4] sm:$0xf]  ;;  %v3494_v20 = vld [vmem:[#allocation3 + $0x3f4] sm:$0xf0] }
  0x47   :  { %1108 = vmatpush.bf16.msra.mxu3 %v2814_v46  ;;  %v2622_v29 = vor.u32 %v3439_v26, %v2619_v27  ;;  %v2747_v30 = vld [vmem:[#allocation3 + $0x350] sm:$0xf0]  ;;  %v3399_v34 = vld [vmem:[#allocation3 + $0x104] sm:$0xf]  ;;  %v2417_v21 = vld [vmem:[#allocation3 + $0xa8] sm:$0xf]  ;;  %v2706_v27 = vor.u32 %v3462_v15, %v2705_v14 }
  0x48   :  { %1070 = vmatpush.bf16.msra.mxu0 %v2414_v45  ;;  %v2750_v31 = vor.u32 %v3471_v28, %v2747_v30  ;;  %v2331_v33 = vld [vmem:[#allocation3 + $0x10] sm:$0xf0]  ;;  %v3435_v38 = vld [vmem:[#allocation3 + $0x224] sm:$0xf]  ;;  %v2545_v24 = vld [vmem:[#allocation3 + $0x1a8] sm:$0xf] }
  0x49   :  { %1083 = vmatpush.bf16.msra.mxu1 %v2542_v50  ;;  %v2334_v35 = vor.u32 %v3367_v32, %v2331_v33  ;;  %v2459_v36 = vld [vmem:[#allocation3 + $0x110] sm:$0xf0]  ;;  %v3467_v41 = vld [vmem:[#allocation3 + $0x324] sm:$0xf]  ;;  %v84_v50 = vld [vmem:[%s3923_s2] sm:$0xf] }
  0x4a   :  { %1096 = vmatpush.bf16.msra.mxu2 %v2670_v56  ;;  %v2462_v37 = vor.u32 %v3399_v34, %v2459_v36  ;;  %v2603_v39 = vld [vmem:[#allocation3 + $0x230] sm:$0xf0]  ;;  %v3431_v44 = vld [vmem:[#allocation3 + $0x204] sm:$0xf]  ;;  %v86_v51 = vperm.slane %v84_v50, 0  ;;  %v87_v52 = vperm.slane %v84_v50, 1 }
  0x4b   :  { %1109 = vmatpush.bf16.msra.mxu3 %v2798_v58  ;;  %v2606_v40 = vor.u32 %v3435_v38, %v2603_v39  ;;  %v2731_v42 = vld [vmem:[#allocation3 + $0x330] sm:$0xf0]  ;;  %v3463_v47 = vld [vmem:[#allocation3 + $0x304] sm:$0xf]  ;;  %v2449_v56 = vld [vmem:[#allocation3 + $0xe8] sm:$0xf] }
  0x4c   :  { %1071 = vmatpush.bf16.msra.mxu0 %v2398_v57  ;;  %v2734_v43 = vor.u32 %v3467_v41, %v2731_v42  ;;  %v2587_v45 = vld [vmem:[#allocation3 + $0x210] sm:$0xf0]  ;;  %v3398_v57 = vld [vmem:[#allocation3 + $0xf4] sm:$0xf0]  ;;  %v88_v63 = vperm.slane %v84_v50, 2  ;;  %v89_v2 = vperm.slane %v84_v50, 3 }
  0x4d   :  { %1084 = vmatpush.bf16.msra.mxu1 %v2526_v62  ;;  %v2590_v46 = vor.u32 %v3431_v44, %v2587_v45  ;;  %v2715_v48 = vld [vmem:[#allocation3 + $0x310] sm:$0xf0]  ;;  %v2450_v0 = vor.u32 %v3398_v57, %v2449_v56  ;;  %v3458_v32 = vld [vmem:[#allocation3 + $0x2d4] sm:$0xf0]  ;;  %v2817_v33 = vld [vmem:[#allocation3 + $0x3c8] sm:$0xf] }
  0x4e   :  { %1097 = vmatpush.bf16.msra.mxu2 %v2654_v4  ;;  %v2718_v49 = vor.u32 %v3463_v47, %v2715_v48  ;;  %v2433_v4 = vld [vmem:[#allocation3 + $0xc8] sm:$0xf]  ;;  %v3490_v36 = vld [vmem:[#allocation3 + $0x3d4] sm:$0xf0] }
  0x4f   :  { %1110 = vmatpush.bf16.msra.mxu3 %v2782_v6  ;;  %v3386_v38 = vld [vmem:[#allocation3 + $0x94] sm:$0xf0]  ;;  %v2529_v39 = vld [vmem:[#allocation3 + $0x188] sm:$0xf]  ;;  %v2818_v44 = vor.u32 %v3490_v36, %v2817_v33  ;;  %v3428_v33 = vld [vmem:[#allocation3 + $0x1ec] sm:$0xf] }
  0x50   :  { %1072 = vmatpush.bf16.msra.mxu0 %v2382_v5  ;;  %v3394_v5 = vld [vmem:[#allocation3 + $0xd4] sm:$0xf0]  ;;  %v2657_v57 = vld [vmem:[#allocation3 + $0x288] sm:$0xf] }
  0x51   :  { %1085 = vmatpush.bf16.msra.mxu1 %v2510_v7  ;;  %v2561_v7 = vld [vmem:[#allocation3 + $0x1c8] sm:$0xf]  ;;  %v3454_v47 = vld [vmem:[#allocation3 + $0x2b4] sm:$0xf0] }
  0x52   :  { %1098 = vmatpush.bf16.msra.mxu2 %v2638_v17  ;;  %v3486_v50 = vld [vmem:[#allocation3 + $0x3b4] sm:$0xf0]  ;;  %v2481_v15 = vld [vmem:[#allocation3 + $0x128] sm:$0xf] }
  0x53   :  { %1111 = vmatpush.bf16.msra.mxu3 %v2766_v19  ;;  %v2562_v19 = vor.u32 %v3426_v8, %v2561_v7  ;;  %v2641_v7 = vld [vmem:[#allocation3 + $0x268] sm:$0xf]  ;;  %v3446_v8 = vld [vmem:[#allocation3 + $0x274] sm:$0xf0] }
  0x54   :  { %1073 = vmatpush.bf16.msra.mxu0 %v2366_v12  ;;  %v3374_v14 = vld [vmem:[#allocation3 + $0x34] sm:$0xf0] }
  0x55   :  { %1086 = vmatpush.bf16.msra.mxu1 %v2494_v13  ;;  %v2434_v13 = vor.u32 %v3394_v5, %v2433_v4 }
  0x56   :  { %1099 = vmatpush.bf16.msra.mxu2 %v2622_v29  ;;  %v2834_v29 = vor.u32 %v3494_v20, %v2833_v16  ;;  %v3406_v16 = vld [vmem:[#allocation3 + $0x134] sm:$0xf0] }
  0x57   :  { %1112 = vmatpush.bf16.msra.mxu3 %v2750_v31  ;;  %v2689_v31 = vld [vmem:[#allocation3 + $0x2c8] sm:$0xf]  ;;  %v3442_v20 = vld [vmem:[#allocation3 + $0x254] sm:$0xf0] }
  0x58   :  { %1074 = vmatpush.bf16.msra.mxu0 %v2350_v22  ;;  %v3390_v22 = vld [vmem:[#allocation3 + $0xb4] sm:$0xf0]  ;;  %v2690_v42 = vor.u32 %v3458_v32, %v2689_v31  ;;  %v2451_v32 = vld [vmem:[#allocation3 + $0xf8] sm:$0xf0] }
  0x59   :  { %1087 = vmatpush.bf16.msra.mxu1 %v2478_v25  ;;  %v3422_v25 = vld [vmem:[#allocation3 + $0x1b4] sm:$0xf0]  ;;  %v2418_v30 = vor.u32 %v3390_v22, %v2417_v21  ;;  %v2753_v21 = vld [vmem:[#allocation3 + $0x348] sm:$0xf] }
  0x5a   :  { %1100 = vmatpush.bf16.msra.mxu2 %v2606_v40  ;;  %v3418_v40 = vld [vmem:[#allocation3 + $0x194] sm:$0xf0] }
  0x5b   :  { %1113 = vmatpush.bf16.msra.mxu3 %v2734_v43  ;;  %v2530_v48 = vor.u32 %v3418_v40, %v2529_v39 }
  0x5c   :  { %1075 = vmatpush.bf16.msra.mxu0 %v2334_v35  ;;  %v2546_v35 = vor.u32 %v3422_v25, %v2545_v24  ;;  %v3474_v24 = vld [vmem:[#allocation3 + $0x354] sm:$0xf0]  ;;  %v2337_v25 = vld [vmem:[#allocation3 + $0x8] sm:$0xf] }
  0x5d   :  { %1088 = vmatpush.bf16.msra.mxu1 %v2462_v37  ;;  %v2401_v37 = vld [vmem:[#allocation3 + $0x88] sm:$0xf]  ;;  %v2754_v36 = vor.u32 %v3474_v24, %v2753_v21  ;;  %v2803_v24 = vld [vmem:[#allocation3 + $0x3b8] sm:$0xf0] }
  0x5e   :  { %1101 = vmatpush.bf16.msra.mxu2 %v2590_v46  ;;  %v2402_v45 = vor.u32 %v3386_v38, %v2401_v37  ;;  %v2673_v46 = vld [vmem:[#allocation3 + $0x2a8] sm:$0xf]  ;;  %v3438_v38 = vld [vmem:[#allocation3 + $0x234] sm:$0xf0] }
  0x5f   :  { %1114 = vmatpush.bf16.msra.mxu3 %v2718_v49  ;;  %v2801_v49 = vld [vmem:[#allocation3 + $0x3a8] sm:$0xf] }
  0x60   :  { %v2802_v56 = vor.u32 %v3486_v50, %v2801_v49  ;;  %v2609_v37 = vld [vmem:[#allocation3 + $0x228] sm:$0xf]  ;;  %v2563_v49 = vld [vmem:[#allocation3 + $0x1d8] sm:$0xf0] }
  0x9c   :  { %v187_v53 = vpop.f32.mrf.mxu0 }
  0x9d   :  { %v188_v54 = vadd.f32 %v187_v53, %v86_v51  ;;  %v200_v55 = vpop.f32.mrf.mxu1  ;;  %v2385_v51 = vld [vmem:[#allocation3 + $0x68] sm:$0xf] }
  0x9e   :  { %v201_v58 = vadd.f32 %v200_v55, %v87_v52  ;;  %v3382_v52 = vld [vmem:[#allocation3 + $0x74] sm:$0xf0]  ;;  %v2513_v53 = vld [vmem:[#allocation3 + $0x168] sm:$0xf]  ;;  %v2674_v55 = vor.u32 %v3454_v47, %v2673_v46  ;;  %v2610_v46 = vor.u32 %v3438_v38, %v2609_v37  ;;  %v2435_v47 = vld [vmem:[#allocation3 + $0xd8] sm:$0xf0] }
  0x9f   :  { %v230_v61 = vmax.f32 %v188_v54, 0.0  ;;  %v3414_v54 = vld [vmem:[#allocation3 + $0x174] sm:$0xf0]  ;;  %v2386_v59 = vor.u32 %v3382_v52, %v2385_v51  ;;  %v2593_v51 = vld [vmem:[#allocation3 + $0x208] sm:$0xf] }
  0xa0   :  { %v231_v62 = vmax.f32 %v201_v58, 0.0  ;;  %v3450_v58 = vld [vmem:[#allocation3 + $0x294] sm:$0xf0]  ;;  %v2514_v60 = vor.u32 %v3414_v54, %v2513_v53  ;;  %v2721_v53 = vld [vmem:[#allocation3 + $0x308] sm:$0xf] }
  0xa1   :  { %v3849_v1 = vpack.c.bf16 %v230_v61, %v230_v61  ;;  %v2785_v61 = vld [vmem:[#allocation3 + $0x388] sm:$0xf]  ;;  %v2658_v4 = vor.u32 %v3450_v58, %v2657_v57  ;;  %v3434_v52 = vld [vmem:[#allocation3 + $0x214] sm:$0xf0]  ;;  %v3480_v37 = vld [vmem:[#allocation3 + $0x38c] sm:$0xf] }
  0xa2   :  { %v3851_v6 = vpack.c.bf16 %v231_v62, %v231_v62  ;;  %v3482_v62 = vld [vmem:[#allocation3 + $0x394] sm:$0xf0]  ;;  %v2787_v38 = vld [vmem:[#allocation3 + $0x398] sm:$0xf0] }
  0xa3   :  { %1024 = vmatmul.bf16.vlgmr.msrb.gmra.mxu0 %v3849_v1  ;;  %v2786_v5 = vor.u32 %v3482_v62, %v2785_v61  ;;  %v3466_v54 = vld [vmem:[#allocation3 + $0x314] sm:$0xf0]  ;;  %v3388_v61 = vld [vmem:[#allocation3 + $0xac] sm:$0xf]  ;;  %v2594_v62 = vor.u32 %v3434_v52, %v2593_v51  ;;  %v2355_v52 = vld [vmem:[#allocation3 + $0x38] sm:$0xf0] }
  0xa4   :  { %v213_v9 = vpop.f32.mrf.mxu2  ;;  %1037 = vmatmul.bf16.vlgmr.msrb.gmra.mxu1 %v3851_v6  ;;  %1120 = vmatpush.bf16.msrb.mxu0 %v2450_v0  ;;  %v189_v12 = vpop.f32.mrf.mxu0  ;;  %v3378_v0 = vld [vmem:[#allocation3 + $0x54] sm:$0xf0]  ;;  %v3372_v51 = vld [vmem:[#allocation3 + $0x2c] sm:$0xf] }
  0xa5   :  { %v214_v10 = vadd.f32 %v213_v9, %v88_v63  ;;  %v226_v11 = vpop.f32.mrf.mxu3  ;;  %1133 = vmatpush.bf16.msrb.mxu1 %v2578_v3  ;;  %v202_v18 = vpop.f32.mrf.mxu1  ;;  %v2369_v63 = vld [vmem:[#allocation3 + $0x48] sm:$0xf]  ;;  %v3410_v3 = vld [vmem:[#allocation3 + $0x154] sm:$0xf0] }
  0xa6   :  { %v227_v17 = vadd.f32 %v226_v11, %v89_v2  ;;  %v2497_v2 = vld [vmem:[#allocation3 + $0x148] sm:$0xf]  ;;  %v2370_v9 = vor.u32 %v3378_v0, %v2369_v63  ;;  %v3478_v12 = vld [vmem:[#allocation3 + $0x374] sm:$0xf0]  ;;  %v2419_v63 = vld [vmem:[#allocation3 + $0xb8] sm:$0xf0] }
  0xa7   :  { %v232_v23 = vmax.f32 %v214_v10, 0.0  ;;  %v2498_v10 = vor.u32 %v3410_v3, %v2497_v2  ;;  %v2769_v11 = vld [vmem:[#allocation3 + $0x368] sm:$0xf]  ;;  %v3420_v0 = vld [vmem:[#allocation3 + $0x1ac] sm:$0xf]  ;;  %v2722_v3 = vor.u32 %v3466_v54, %v2721_v53 }
  0xa8   :  { %v233_v26 = vmax.f32 %v227_v17, 0.0  ;;  %1121 = vmatpush.bf16.msrb.mxu0 %v2434_v13  ;;  %v2353_v13 = vld [vmem:[#allocation3 + $0x28] sm:$0xf]  ;;  %v2642_v17 = vor.u32 %v3446_v8, %v2641_v7  ;;  %v2770_v18 = vor.u32 %v3478_v12, %v2769_v11  ;;  %v2547_v2 = vld [vmem:[#allocation3 + $0x1b8] sm:$0xf0] }
  0xa9   :  { %v3855_v28 = vpack.c.bf16 %v232_v23, %v232_v23  ;;  %1134 = vmatpush.bf16.msrb.mxu1 %v2562_v19  ;;  %v2625_v19 = vld [vmem:[#allocation3 + $0x248] sm:$0xf]  ;;  %v2354_v22 = vor.u32 %v3374_v14, %v2353_v13  ;;  %v2482_v23 = vor.u32 %v3406_v16, %v2481_v15  ;;  %v3456_v7 = vld [vmem:[#allocation3 + $0x2cc] sm:$0xf]  ;;  %v2691_v8 = vld [vmem:[#allocation3 + $0x2d8] sm:$0xf0] }
  0xaa   :  { %v3857_v34 = vpack.c.bf16 %v233_v26, %v233_v26  ;;  %v3370_v26 = vld [vmem:[#allocation3 + $0x14] sm:$0xf0]  ;;  %v2626_v31 = vor.u32 %v3442_v20, %v2625_v19  ;;  %v3488_v11 = vld [vmem:[#allocation3 + $0x3cc] sm:$0xf]  ;;  %v2819_v12 = vld [vmem:[#allocation3 + $0x3d8] sm:$0xf0] }
  0xab   :  { %1050 = vmatmul.bf16.vlgmr.msrb.gmra.mxu2 %v3855_v28  ;;  %v2338_v39 = vor.u32 %v3370_v26, %v2337_v25  ;;  %v3384_v13 = vld [vmem:[#allocation3 + $0x8c] sm:$0xf]  ;;  %v2403_v14 = vld [vmem:[#allocation3 + $0x98] sm:$0xf0] }
  0xac   :  { %1063 = vmatmul.bf16.vlgmr.msrb.gmra.mxu3 %v3857_v34  ;;  %1146 = vmatpush.bf16.msrb.mxu2 %v2706_v27  ;;  %v215_v41 = vpop.f32.mrf.mxu2  ;;  %v2465_v27 = vld [vmem:[#allocation3 + $0x108] sm:$0xf]  ;;  %v3416_v15 = vld [vmem:[#allocation3 + $0x18c] sm:$0xf]  ;;  %v2531_v16 = vld [vmem:[#allocation3 + $0x198] sm:$0xf0]  ;;  %v2406_v21 = vor.u32 %v3384_v13, %v2403_v14 }
  0xad   :  { %1159 = vmatpush.bf16.msrb.mxu3 %v2834_v29  ;;  %v228_v43 = vpop.f32.mrf.mxu3  ;;  %1122 = vmatpush.bf16.msrb.mxu0 %v2418_v30  ;;  %v3402_v29 = vld [vmem:[#allocation3 + $0x114] sm:$0xf0]  ;;  %v3396_v30 = vld [vmem:[#allocation3 + $0xec] sm:$0xf]  ;;  %v2737_v41 = vld [vmem:[#allocation3 + $0x328] sm:$0xf] }
  0xae   :  { %1135 = vmatpush.bf16.msrb.mxu1 %v2546_v35  ;;  %v2579_v35 = vld [vmem:[#allocation3 + $0x1f8] sm:$0xf0]  ;;  %v2466_v40 = vor.u32 %v3402_v29, %v2465_v27  ;;  %v2454_v43 = vor.u32 %v3396_v30, %v2451_v32  ;;  %v3452_v19 = vld [vmem:[#allocation3 + $0x2ac] sm:$0xf] }
  0xaf   :  { %v2675_v20 = vld [vmem:[#allocation3 + $0x2b8] sm:$0xf0]  ;;  %v3380_v25 = vld [vmem:[#allocation3 + $0x6c] sm:$0xf] }
  0xb0   :  { %1147 = vmatpush.bf16.msrb.mxu2 %v2690_v42  ;;  %v3470_v42 = vld [vmem:[#allocation3 + $0x334] sm:$0xf0]  ;;  %v2387_v26 = vld [vmem:[#allocation3 + $0x78] sm:$0xf0]  ;;  %v3412_v27 = vld [vmem:[#allocation3 + $0x16c] sm:$0xf]  ;;  %v2678_v30 = vor.u32 %v3452_v19, %v2675_v20 }
  0xb1   :  { %1160 = vmatpush.bf16.msrb.mxu3 %v2818_v44  ;;  %1123 = vmatpush.bf16.msrb.mxu0 %v2402_v45  ;;  %v2582_v44 = vor.u32 %v3428_v33, %v2579_v35  ;;  %v3392_v45 = vld [vmem:[#allocation3 + $0xcc] sm:$0xf]  ;;  %v2738_v50 = vor.u32 %v3470_v42, %v2737_v41  ;;  %v2515_v29 = vld [vmem:[#allocation3 + $0x178] sm:$0xf0]  ;;  %v2390_v35 = vor.u32 %v3380_v25, %v2387_v26 }
  0xb2   :  { %1136 = vmatpush.bf16.msrb.mxu1 %v2530_v48  ;;  %v3424_v48 = vld [vmem:[#allocation3 + $0x1cc] sm:$0xf]  ;;  %v2438_v57 = vor.u32 %v3392_v45, %v2435_v47  ;;  %v2659_v33 = vld [vmem:[#allocation3 + $0x298] sm:$0xf0] }
  0xb3   :  { %1076 = vmatmul.bf16.vlgmr.msra.gmra.mxu0 %v3849_v1  ;;  %v2566_v58 = vor.u32 %v3424_v48, %v2563_v49  ;;  %v3448_v32 = vld [vmem:[#allocation3 + $0x28c] sm:$0xf]  ;;  %v2499_v42 = vld [vmem:[#allocation3 + $0x158] sm:$0xf0] }
  0xb4   :  { %1148 = vmatpush.bf16.msrb.mxu2 %v2674_v55  ;;  %1089 = vmatmul.bf16.vlgmr.msra.gmra.mxu1 %v3851_v6  ;;  %v3460_v55 = vld [vmem:[#allocation3 + $0x2ec] sm:$0xf]  ;;  %v2483_v54 = vld [vmem:[#allocation3 + $0x138] sm:$0xf0] }
  0xb5   :  { %1161 = vmatpush.bf16.msrb.mxu3 %v2802_v56  ;;  %1124 = vmatpush.bf16.msrb.mxu0 %v2386_v59  ;;  %v2707_v56 = vld [vmem:[#allocation3 + $0x2f8] sm:$0xf0]  ;;  %v3492_v59 = vld [vmem:[#allocation3 + $0x3ec] sm:$0xf] }
  0xb6   :  { %1137 = vmatpush.bf16.msrb.mxu1 %v2514_v60  ;;  %v2835_v60 = vld [vmem:[#allocation3 + $0x3f8] sm:$0xf0]  ;;  %v3408_v41 = vld [vmem:[#allocation3 + $0x14c] sm:$0xf] }
  0xb7   :  { %v3444_v45 = vld [vmem:[#allocation3 + $0x26c] sm:$0xf]  ;;  %v2502_v48 = vor.u32 %v3408_v41, %v2499_v42  ;;  %v2595_v26 = vld [vmem:[#allocation3 + $0x218] sm:$0xf0]  ;;  %v3193_v42 = vld [vmem:[#allocation5 + $0x2c0] sm:$0xf] }
  0xb8   :  { %1149 = vmatpush.bf16.msrb.mxu2 %v2658_v4  ;;  %v2710_v4 = vor.u32 %v3460_v55, %v2707_v56  ;;  %v3476_v49 = vld [vmem:[#allocation3 + $0x36c] sm:$0xf] }
  0xb9   :  { %1162 = vmatpush.bf16.msrb.mxu3 %v2786_v5  ;;  %1125 = vmatpush.bf16.msrb.mxu0 %v2370_v9  ;;  %v2838_v5 = vor.u32 %v3492_v59, %v2835_v60  ;;  %v2422_v9 = vor.u32 %v3388_v61, %v2419_v63  ;;  %v3404_v53 = vld [vmem:[#allocation3 + $0x12c] sm:$0xf]  ;;  %v2358_v60 = vor.u32 %v3372_v51, %v2355_v52  ;;  %v3509_v51 = vld [vmem:[#allocation5 + $0x6c] sm:$0xf0] }
  0xba   :  { %1138 = vmatpush.bf16.msrb.mxu1 %v2498_v10  ;;  %v2550_v10 = vor.u32 %v3420_v0, %v2547_v2  ;;  %v3472_v59 = vld [vmem:[#allocation3 + $0x34c] sm:$0xf]  ;;  %v2486_v61 = vor.u32 %v3404_v53, %v2483_v54  ;;  %v2339_v0 = vld [vmem:[#allocation3 + $0x18] sm:$0xf0]  ;;  %v3017_v53 = vld [vmem:[#allocation5 + $0x160] sm:$0xf] }
  0xbb   :  { %1102 = vmatmul.bf16.vlgmr.msra.gmra.mxu2 %v3855_v28  ;;  %v3368_v63 = vld [vmem:[#allocation3 + $0xc] sm:$0xf]  ;;  %v3541_v54 = vld [vmem:[#allocation5 + $0x16c] sm:$0xf0] }
  0xbc   :  { %1115 = vmatmul.bf16.vlgmr.msra.gmra.mxu3 %v3857_v34  ;;  %1150 = vmatpush.bf16.msrb.mxu2 %v2642_v17  ;;  %v2694_v17 = vor.u32 %v3456_v7, %v2691_v8  ;;  %v3400_v2 = vld [vmem:[#allocation3 + $0x10c] sm:$0xf]  ;;  %v3525_v7 = vld [vmem:[#allocation5 + $0xec] sm:$0xf0]  ;;  %v3081_v8 = vld [vmem:[#allocation5 + $0x1e0] sm:$0xf]  ;;  %v2342_v13 = vor.u32 %v3368_v63, %v2339_v0 }
  0xbd   :  { %1163 = vmatpush.bf16.msrb.mxu3 %v2770_v18  ;;  %1126 = vmatpush.bf16.msrb.mxu0 %v2354_v22  ;;  %v2822_v18 = vor.u32 %v3488_v11, %v2819_v12  ;;  %v2534_v22 = vor.u32 %v3416_v15, %v2531_v16  ;;  %v3436_v11 = vld [vmem:[#allocation3 + $0x22c] sm:$0xf]  ;;  %v2611_v12 = vld [vmem:[#allocation3 + $0x238] sm:$0xf0]  ;;  %v2841_v0 = vld [vmem:[#allocation5] sm:$0xf] }
  0xbe   :  { %1139 = vmatpush.bf16.msrb.mxu1 %v2482_v23  ;;  %v3484_v23 = vld [vmem:[#allocation3 + $0x3ac] sm:$0xf]  ;;  %v2739_v16 = vld [vmem:[#allocation3 + $0x338] sm:$0xf0]  ;;  %v2614_v20 = vor.u32 %v3436_v11, %v2611_v12  ;;  %v3515_v11 = vld [vmem:[#allocation5 + $0xa4] sm:$0xf] }
  0xbf   :  { %v3468_v15 = vld [vmem:[#allocation3 + $0x32c] sm:$0xf]  ;;  %v2923_v12 = vld [vmem:[#allocation5 + $0xb0] sm:$0xf0] }
  0xc0   :  { %1151 = vmatpush.bf16.msrb.mxu2 %v2626_v31  ;;  %v2806_v31 = vor.u32 %v3484_v23, %v2803_v24  ;;  %v3553_v23 = vld [vmem:[#allocation5 + $0x1cc] sm:$0xf0]  ;;  %v2742_v24 = vor.u32 %v3468_v15, %v2739_v16  ;;  %v3432_v25 = vld [vmem:[#allocation3 + $0x20c] sm:$0xf]  ;;  %v3177_v16 = vld [vmem:[#allocation5 + $0x2a0] sm:$0xf] }
  0xc1   :  { %1164 = vmatpush.bf16.msrb.mxu3 %v2754_v36  ;;  %1127 = vmatpush.bf16.msrb.mxu0 %v2338_v39  ;;  %v2518_v36 = vor.u32 %v3412_v27, %v2515_v29  ;;  %v3376_v39 = vld [vmem:[#allocation3 + $0x4c] sm:$0xf]  ;;  %v2723_v29 = vld [vmem:[#allocation3 + $0x318] sm:$0xf0]  ;;  %v3533_v15 = vld [vmem:[#allocation5 + $0x12c] sm:$0xf0] }
  0xc2   :  { %1140 = vmatpush.bf16.msrb.mxu1 %v2466_v40  ;;  %v2371_v40 = vld [vmem:[#allocation3 + $0x58] sm:$0xf0]  ;;  %v3464_v27 = vld [vmem:[#allocation3 + $0x30c] sm:$0xf] }
  0xc3   :  { %v2374_v47 = vor.u32 %v3376_v39, %v2371_v40  ;;  %v3049_v39 = vld [vmem:[#allocation5 + $0x1a0] sm:$0xf]  ;;  %v3549_v40 = vld [vmem:[#allocation5 + $0x1ac] sm:$0xf0] }
  0xc4   :  { %1152 = vmatpush.bf16.msrb.mxu2 %v2610_v46  ;;  %1128 = vmatmul.bf16.vlgmr.msrb.gmra.mxu0 %v3849_v1  ;;  %v2643_v46 = vld [vmem:[#allocation3 + $0x278] sm:$0xf0] }
  0xc5   :  { %1172 = vmatpush.bf16.msra.mxu0 %v2454_v43  ;;  %1165 = vmatpush.bf16.msrb.mxu3 %v2738_v50  ;;  %v2662_v43 = vor.u32 %v3448_v32, %v2659_v33  ;;  %v2771_v50 = vld [vmem:[#allocation3 + $0x378] sm:$0xf0]  ;;  %v2646_v55 = vor.u32 %v3444_v45, %v2643_v46  ;;  %v2905_v45 = vld [vmem:[#allocation5 + $0x80] sm:$0xf]  ;;  %v3513_v46 = vld [vmem:[#allocation5 + $0x8c] sm:$0xf0] }
  0xc6   :  { %1185 = vmatpush.bf16.msra.mxu1 %v2582_v44  ;;  %v2790_v44 = vor.u32 %v3480_v37, %v2787_v38  ;;  %v2774_v56 = vor.u32 %v3476_v49, %v2771_v50  ;;  %v3517_v37 = vld [vmem:[#allocation5 + $0xac] sm:$0xf0]  ;;  %v2726_v38 = vor.u32 %v3464_v27, %v2723_v29  ;;  %v2906_v50 = vor.u32 %v3513_v46, %v2905_v45  ;;  %v3129_v46 = vld [vmem:[#allocation5 + $0x240] sm:$0xf] }
  0xc7   :  { %1141 = vmatmul.bf16.vlgmr.msrb.gmra.mxu1 %v3851_v6  ;;  %v3545_v49 = vld [vmem:[#allocation5 + $0x18c] sm:$0xf0] }
  0xc8   :  { %1153 = vmatpush.bf16.msrb.mxu2 %v2594_v62  ;;  %v2755_v62 = vld [vmem:[#allocation3 + $0x358] sm:$0xf0]  ;;  %v3577_v27 = vld [vmem:[#allocation5 + $0x28c] sm:$0xf0] }
  0xc9   :  { %1173 = vmatpush.bf16.msra.mxu0 %v2438_v57  ;;  %1166 = vmatpush.bf16.msrb.mxu3 %v2722_v3  ;;  %v3440_v57 = vld [vmem:[#allocation3 + $0x24c] sm:$0xf]  ;;  %v2467_v3 = vld [vmem:[#allocation3 + $0x118] sm:$0xf0] }
  0xca   :  { %1186 = vmatpush.bf16.msra.mxu1 %v2566_v58  ;;  %v2627_v58 = vld [vmem:[#allocation3 + $0x258] sm:$0xf0]  ;;  %v2470_v14 = vor.u32 %v3400_v2, %v2467_v3  ;;  %v3497_v2 = vld [vmem:[#allocation5 + $0xc] sm:$0xf0]  ;;  %v3523_v3 = vld [vmem:[#allocation5 + $0xe4] sm:$0xf] }
  0xcb   :  { %1154 = vmatmul.bf16.vlgmr.msrb.gmra.mxu2 %v3855_v28 }
  0xcc   :  { %1198 = vmatpush.bf16.msra.mxu2 %v2710_v4  ;;  %1167 = vmatmul.bf16.vlgmr.msrb.gmra.mxu3 %v3857_v34  ;;  %v2953_v4 = vld [vmem:[#allocation5 + $0xe0] sm:$0xf] }
  0xcd   :  { %1211 = vmatpush.bf16.msra.mxu3 %v2838_v5  ;;  %1174 = vmatpush.bf16.msra.mxu0 %v2422_v9  ;;  %v2630_v5 = vor.u32 %v3440_v57, %v2627_v58  ;;  %v3557_v9 = vld [vmem:[#allocation5 + $0x1ec] sm:$0xf0]  ;;  %v3018_v58 = vor.u32 %v3541_v54, %v3017_v53  ;;  %v3113_v53 = vld [vmem:[#allocation5 + $0x220] sm:$0xf] }
  0xce   :  { %1187 = vmatpush.bf16.msra.mxu1 %v2550_v10  ;;  %v2758_v10 = vor.u32 %v3472_v59, %v2755_v62  ;;  %v3082_v19 = vor.u32 %v3557_v9, %v3081_v8  ;;  %v3505_v57 = vld [vmem:[#allocation5 + $0x4c] sm:$0xf0]  ;;  %v3001_v59 = vld [vmem:[#allocation5 + $0x140] sm:$0xf]  ;;  %v3519_v8 = vld [vmem:[#allocation5 + $0xc4] sm:$0xf] }
  0xcf   :  { %v3501_v62 = vld [vmem:[#allocation5 + $0x2c] sm:$0xf0]  ;;  %v2939_v9 = vld [vmem:[#allocation5 + $0xd0] sm:$0xf0] }
  0xd0   :  { %1199 = vmatpush.bf16.msra.mxu2 %v2694_v17  ;;  %v2954_v17 = vor.u32 %v3525_v7, %v2953_v4  ;;  %v2955_v4 = vld [vmem:[#allocation5 + $0xf0] sm:$0xf0]  ;;  %v3565_v54 = vld [vmem:[#allocation5 + $0x22c] sm:$0xf0] }
  0xd1   :  { %1212 = vmatpush.bf16.msra.mxu3 %v2822_v18  ;;  %1175 = vmatpush.bf16.msra.mxu0 %v2406_v21  ;;  %v2937_v18 = vld [vmem:[#allocation5 + $0xc0] sm:$0xf]  ;;  %v3521_v21 = vld [vmem:[#allocation5 + $0xcc] sm:$0xf0]  ;;  %v2958_v7 = vor.u32 %v3523_v3, %v2955_v4  ;;  %v3019_v3 = vld [vmem:[#allocation5 + $0x170] sm:$0xf0] }
  0xd2   :  { %1188 = vmatpush.bf16.msra.mxu1 %v2534_v22  ;;  %v3065_v22 = vld [vmem:[#allocation5 + $0x1c0] sm:$0xf]  ;;  %v2938_v32 = vor.u32 %v3521_v21, %v2937_v18  ;;  %v3581_v18 = vld [vmem:[#allocation5 + $0x2ac] sm:$0xf0] }
  0xd3   :  { %v3066_v33 = vor.u32 %v3553_v23, %v3065_v22  ;;  %v3178_v21 = vor.u32 %v3581_v18, %v3177_v16  ;;  %v2969_v23 = vld [vmem:[#allocation5 + $0x100] sm:$0xf] }
  0xd4   :  { %1200 = vmatpush.bf16.msra.mxu2 %v2678_v30  ;;  %v3209_v30 = vld [vmem:[#allocation5 + $0x2e0] sm:$0xf] }
  0xd5   :  { %1213 = vmatpush.bf16.msra.mxu3 %v2806_v31  ;;  %1176 = vmatpush.bf16.msra.mxu0 %v2390_v35  ;;  %v3589_v31 = vld [vmem:[#allocation5 + $0x2ec] sm:$0xf0]  ;;  %v2598_v35 = vor.u32 %v3432_v25, %v2595_v26  ;;  %v3161_v25 = vld [vmem:[#allocation5 + $0x280] sm:$0xf] }
  0xd6   :  { %1189 = vmatpush.bf16.msra.mxu1 %v2518_v36  ;;  %v2921_v36 = vld [vmem:[#allocation5 + $0xa0] sm:$0xf]  ;;  %v3210_v41 = vor.u32 %v3589_v31, %v3209_v30  ;;  %v3162_v29 = vor.u32 %v3577_v27, %v3161_v25  ;;  %v3507_v30 = vld [vmem:[#allocation5 + $0x64] sm:$0xf]  ;;  %v2891_v31 = vld [vmem:[#allocation5 + $0x70] sm:$0xf0] }
  0xd7   :  { %v2987_v25 = vld [vmem:[#allocation5 + $0x130] sm:$0xf0] }
  0xd8   :  { %1201 = vmatpush.bf16.msra.mxu2 %v2662_v43  ;;  %v3585_v43 = vld [vmem:[#allocation5 + $0x2cc] sm:$0xf0] }
  0xd9   :  { %1214 = vmatpush.bf16.msra.mxu3 %v2790_v44  ;;  %1177 = vmatpush.bf16.msra.mxu0 %v2374_v47  ;;  %v2922_v44 = vor.u32 %v3517_v37, %v2921_v36  ;;  %v3050_v47 = vor.u32 %v3549_v40, %v3049_v39  ;;  %v3145_v36 = vld [vmem:[#allocation5 + $0x260] sm:$0xf]  ;;  %v3573_v37 = vld [vmem:[#allocation5 + $0x26c] sm:$0xf0]  ;;  %v3503_v40 = vld [vmem:[#allocation5 + $0x44] sm:$0xf] }
  0xda   :  { %1190 = vmatpush.bf16.msra.mxu1 %v2502_v48  ;;  %v3033_v48 = vld [vmem:[#allocation5 + $0x180] sm:$0xf]  ;;  %v3146_v39 = vor.u32 %v3573_v37, %v3145_v36  ;;  %v3527_v37 = vld [vmem:[#allocation5 + $0x104] sm:$0xf] }
  0xdb   :  { %v3034_v52 = vor.u32 %v3545_v49, %v3033_v48  ;;  %v3499_v49 = vld [vmem:[#allocation5 + $0x24] sm:$0xf] }
  0xdc   :  { %1202 = vmatpush.bf16.msra.mxu2 %v2646_v55 }
  0xdd   :  { %1215 = vmatpush.bf16.msra.mxu3 %v2774_v56  ;;  %1178 = vmatpush.bf16.msra.mxu0 %v2358_v60  ;;  %v2873_v56 = vld [vmem:[#allocation5 + $0x40] sm:$0xf]  ;;  %v3537_v60 = vld [vmem:[#allocation5 + $0x14c] sm:$0xf0] }
  0xde   :  { %1191 = vmatpush.bf16.msra.mxu1 %v2486_v61  ;;  %v2857_v61 = vld [vmem:[#allocation5 + $0x20] sm:$0xf] }
  0xdf   :  { %v2858_v63 = vor.u32 %v3501_v62, %v2857_v61  ;;  %v3097_v61 = vld [vmem:[#allocation5 + $0x200] sm:$0xf]  ;;  %v3561_v62 = vld [vmem:[#allocation5 + $0x20c] sm:$0xf0] }
  0xe0   :  { %1203 = vmatpush.bf16.msra.mxu2 %v2630_v5  ;;  %v2842_v5 = vor.u32 %v3497_v2, %v2841_v0  ;;  %v3621_v0 = vld [vmem:[#allocation5 + $0x3ec] sm:$0xf0]  ;;  %v3539_v2 = vld [vmem:[#allocation5 + $0x164] sm:$0xf] }
  0xe1   :  { %1216 = vmatpush.bf16.msra.mxu3 %v2758_v10  ;;  %1179 = vmatpush.bf16.msra.mxu0 %v2342_v13  ;;  %v2942_v10 = vor.u32 %v3519_v8, %v2939_v9  ;;  %v2926_v13 = vor.u32 %v3515_v11, %v2923_v12  ;;  %v3211_v8 = vld [vmem:[#allocation5 + $0x2f0] sm:$0xf0]  ;;  %v3617_v11 = vld [vmem:[#allocation5 + $0x3cc] sm:$0xf0] }
  0xe2   :  { %1192 = vmatpush.bf16.msra.mxu1 %v2470_v14  ;;  %v2985_v14 = vld [vmem:[#allocation5 + $0x120] sm:$0xf] }
  0xe4   :  { %1204 = vmatpush.bf16.msra.mxu2 %v2614_v20  ;;  %1180 = vmatmul.bf16.vlgmr.msra.gmra.mxu0 %v3849_v1  ;;  %v3194_v1 = vor.u32 %v3585_v43, %v3193_v42  ;;  %v2907_v20 = vld [vmem:[#allocation5 + $0x90] sm:$0xf0]  ;;  %v3551_v42 = vld [vmem:[#allocation5 + $0x1c4] sm:$0xf] }
  0xe5   :  { %2010 = vmatpush.bf16.msrb.mxu0 %v2954_v17  ;;  %1217 = vmatpush.bf16.msra.mxu3 %v2742_v24  ;;  %v2986_v17 = vor.u32 %v3533_v15, %v2985_v14  ;;  %v3529_v24 = vld [vmem:[#allocation5 + $0x10c] sm:$0xf0]  ;;  %v3003_v14 = vld [vmem:[#allocation5 + $0x150] sm:$0xf0]  ;;  %v3583_v15 = vld [vmem:[#allocation5 + $0x2c4] sm:$0xf] }
  0xe6   :  { %2023 = vmatpush.bf16.msrb.mxu1 %v3082_v19  ;;  %v3511_v19 = vld [vmem:[#allocation5 + $0x84] sm:$0xf]  ;;  %v2970_v26 = vor.u32 %v3529_v24, %v2969_v23 }
  0xe7   :  { %1193 = vmatmul.bf16.vlgmr.msra.gmra.mxu1 %v3851_v6  ;;  %v2889_v6 = vld [vmem:[#allocation5 + $0x60] sm:$0xf]  ;;  %v2910_v22 = vor.u32 %v3511_v19, %v2907_v20  ;;  %v3531_v24 = vld [vmem:[#allocation5 + $0x124] sm:$0xf] }
  0xe8   :  { %1205 = vmatpush.bf16.msra.mxu2 %v2598_v35  ;;  %v2890_v55 = vor.u32 %v3509_v51, %v2889_v6  ;;  %v3083_v35 = vld [vmem:[#allocation5 + $0x1f0] sm:$0xf0]  ;;  %v3876_v19 = vld [vmem:[%s3925_s4] sm:$0xf] }
  0xe9   :  { %2011 = vmatpush.bf16.msrb.mxu0 %v2938_v32  ;;  %1218 = vmatpush.bf16.msra.mxu3 %v2726_v38  ;;  %v3555_v32 = vld [vmem:[#allocation5 + $0x1e4] sm:$0xf]  ;;  %v3051_v51 = vld [vmem:[#allocation5 + $0x1b0] sm:$0xf0]  ;;  %v3305_v20 = vld [vmem:[#allocation5 + $0x3a0] sm:$0xf] }
  0xea   :  { %2024 = vmatpush.bf16.msrb.mxu1 %v3066_v33  ;;  %v2894_v33 = vor.u32 %v3507_v30, %v2891_v31  ;;  %v3086_v38 = vor.u32 %v3555_v32, %v3083_v35  ;;  %v3179_v30 = vld [vmem:[#allocation5 + $0x2b0] sm:$0xf0]  ;;  %v368_v31 = vperm.slane %v3876_v19, 0  ;;  %v3609_v35 = vld [vmem:[#allocation5 + $0x38c] sm:$0xf0] }
  0xeb   :  { %1206 = vmatmul.bf16.vlgmr.msra.gmra.mxu2 %v3855_v28  ;;  %v2874_v28 = vor.u32 %v3505_v57, %v2873_v56  ;;  %v3495_v56 = vld [vmem:[#allocation5 + $0x4] sm:$0xf]  ;;  %v2843_v57 = vld [vmem:[#allocation5 + $0x10] sm:$0xf0] }
  0xec   :  { %2036 = vmatpush.bf16.msrb.mxu2 %v3210_v41  ;;  %1219 = vmatmul.bf16.vlgmr.msra.gmra.mxu3 %v3857_v34  ;;  %v3002_v34 = vor.u32 %v3537_v60, %v3001_v59  ;;  %v2875_v41 = vld [vmem:[#allocation5 + $0x50] sm:$0xf0]  ;;  %v2846_v59 = vor.u32 %v3495_v56, %v2843_v57 }
  0xed   :  { %2012 = vmatpush.bf16.msrb.mxu0 %v2922_v44  ;;  %v2878_v43 = vor.u32 %v3503_v40, %v2875_v41  ;;  %v3067_v44 = vld [vmem:[#allocation5 + $0x1d0] sm:$0xf0] }
  0xee   :  { %2025 = vmatpush.bf16.msrb.mxu1 %v3050_v47  ;;  %v3070_v45 = vor.u32 %v3551_v42, %v3067_v44  ;;  %v3569_v47 = vld [vmem:[#allocation5 + $0x24c] sm:$0xf0]  ;;  %v3035_v60 = vld [vmem:[#allocation5 + $0x190] sm:$0xf0]  ;;  %v3273_v44 = vld [vmem:[#allocation5 + $0x360] sm:$0xf] }
  0xef   :  { %v3130_v48 = vor.u32 %v3569_v47, %v3129_v46  ;;  %v3163_v41 = vld [vmem:[#allocation5 + $0x290] sm:$0xf0] }
  0xf0   :  { %2037 = vmatpush.bf16.msrb.mxu2 %v3194_v1  ;;  %v2859_v1 = vld [vmem:[#allocation5 + $0x30] sm:$0xf0] }
  0xf1   :  { %2013 = vmatpush.bf16.msrb.mxu0 %v2906_v50  ;;  %v3547_v50 = vld [vmem:[#allocation5 + $0x1a4] sm:$0xf]  ;;  %v2862_v6 = vor.u32 %v3499_v49, %v2859_v1  ;;  %v3147_v49 = vld [vmem:[#allocation5 + $0x270] sm:$0xf0] }
  0xf2   :  { %2026 = vmatpush.bf16.msrb.mxu1 %v3034_v52  ;;  %v3054_v52 = vor.u32 %v3547_v50, %v3051_v51  ;;  %v3257_v51 = vld [vmem:[#allocation5 + $0x340] sm:$0xf] }
  0xf4   :  { %2038 = vmatpush.bf16.msrb.mxu2 %v3178_v21  ;;  %v3613_v21 = vld [vmem:[#allocation5 + $0x3ac] sm:$0xf0] }
  0xf5   :  { %2014 = vmatpush.bf16.msrb.mxu0 %v2890_v55  ;;  %v3114_v55 = vor.u32 %v3565_v54, %v3113_v53  ;;  %v3306_v23 = vor.u32 %v3613_v21, %v3305_v20  ;;  %v3567_v54 = vld [vmem:[#allocation5 + $0x244] sm:$0xf] }
  0xf6   :  { %2027 = vmatpush.bf16.msrb.mxu1 %v3018_v58  ;;  %v3543_v58 = vld [vmem:[#allocation5 + $0x184] sm:$0xf] }
  0xf8   :  { %2039 = vmatpush.bf16.msrb.mxu2 %v3162_v29  ;;  %v2990_v29 = vor.u32 %v3531_v24, %v2987_v25 }
  0xf9   :  { %2015 = vmatpush.bf16.msrb.mxu0 %v2874_v28  ;;  %v3038_v28 = vor.u32 %v3543_v58, %v3035_v60  ;;  %v2961_v60 = vld [vmem:[#allocation5 + $0xe8] sm:$0xf] }
  0xfa   :  { %2028 = vmatpush.bf16.msrb.mxu1 %v3002_v34  ;;  %v3337_v34 = vld [vmem:[#allocation5 + $0x3e0] sm:$0xf] }
  0xfb   :  { %v3338_v4 = vor.u32 %v3621_v0, %v3337_v34 }
  0xfc   :  { %2040 = vmatpush.bf16.msrb.mxu2 %v3146_v39  ;;  %v3575_v39 = vld [vmem:[#allocation5 + $0x284] sm:$0xf] }
  0xfd   :  { %2016 = vmatpush.bf16.msrb.mxu0 %v2858_v63  ;;  %v3098_v63 = vor.u32 %v3561_v62, %v3097_v61  ;;  %2049 = vmatpush.bf16.msrb.mxu3 %v3338_v4  ;;  %v3597_v61 = vld [vmem:[#allocation5 + $0x32c] sm:$0xf0] }
  0xfe   :  { %2029 = vmatpush.bf16.msrb.mxu1 %v2986_v17  ;;  %v3195_v17 = vld [vmem:[#allocation5 + $0x2d0] sm:$0xf0] }
  0xff   :  { %v3198_v18 = vor.u32 %v3583_v15, %v3195_v17  ;;  %v3099_v17 = vld [vmem:[#allocation5 + $0x210] sm:$0xf0] }
 0x100   :  { %2041 = vmatpush.bf16.msrb.mxu2 %v3130_v48  ;;  %v3571_v48 = vld [vmem:[#allocation5 + $0x264] sm:$0xf] }
 0x101   :  { %2017 = vmatpush.bf16.msrb.mxu0 %v2842_v5  ;;  %v3022_v5 = vor.u32 %v3539_v2, %v3019_v3  ;;  %v3150_v50 = vor.u32 %v3571_v48, %v3147_v49  ;;  %v3563_v2 = vld [vmem:[#allocation5 + $0x224] sm:$0xf]  ;;  %v3115_v3 = vld [vmem:[#allocation5 + $0x230] sm:$0xf0]  ;;  %v3510_v48 = vld [vmem:[#allocation5 + $0x74] sm:$0xf0] }
 0x102   :  { %2030 = vmatpush.bf16.msrb.mxu1 %v2970_v26  ;;  %v3579_v26 = vld [vmem:[#allocation5 + $0x2a4] sm:$0xf]  ;;  %v3089_v49 = vld [vmem:[#allocation5 + $0x1e8] sm:$0xf] }
 0x103   :  { %v3182_v32 = vor.u32 %v3579_v26, %v3179_v30  ;;  %v2929_v26 = vld [vmem:[#allocation5 + $0xa8] sm:$0xf]  ;;  %v3518_v30 = vld [vmem:[#allocation5 + $0xb4] sm:$0xf0] }
 0x104   :  { %2042 = vmatpush.bf16.msrb.mxu2 %v3114_v55  ;;  %v3131_v55 = vld [vmem:[#allocation5 + $0x250] sm:$0xf0] }
 0x105   :  { %2062 = vmatpush.bf16.msra.mxu0 %v2958_v7  ;;  %v3587_v7 = vld [vmem:[#allocation5 + $0x2e4] sm:$0xf]  ;;  %v3134_v57 = vor.u32 %v3567_v54, %v3131_v55 }
 0x106   :  { %2075 = vmatpush.bf16.msra.mxu1 %v3086_v38  ;;  %v3214_v9 = vor.u32 %v3587_v7, %v3211_v8  ;;  %v2971_v38 = vld [vmem:[#allocation5 + $0x110] sm:$0xf0]  ;;  %v369_v8 = vperm.slane %v3876_v19, 1 }
 0x107   :  { %v2974_v40 = vor.u32 %v3527_v37, %v2971_v38  ;;  %v2913_v37 = vld [vmem:[#allocation5 + $0x88] sm:$0xf] }
 0x108   :  { %2043 = vmatpush.bf16.msrb.mxu2 %v3098_v63  ;;  %v3526_v63 = vld [vmem:[#allocation5 + $0xf4] sm:$0xf0] }
 0x109   :  { %2063 = vmatpush.bf16.msra.mxu0 %v2942_v10  ;;  %v3321_v10 = vld [vmem:[#allocation5 + $0x3c0] sm:$0xf] }
 0x10a   :  { %2076 = vmatpush.bf16.msra.mxu1 %v3070_v45  ;;  %v3322_v12 = vor.u32 %v3617_v11, %v3321_v10  ;;  %v3605_v45 = vld [vmem:[#allocation5 + $0x36c] sm:$0xf0]  ;;  %v2962_v10 = vor.u32 %v3526_v63, %v2961_v60  ;;  %v3522_v11 = vld [vmem:[#allocation5 + $0xd4] sm:$0xf0]  ;;  %v3073_v60 = vld [vmem:[#allocation5 + $0x1c8] sm:$0xf] }
 0x10b   :  { %v3274_v47 = vor.u32 %v3605_v45, %v3273_v44  ;;  %v370_v63 = vperm.slane %v3876_v19, 2 }
 0x10c   :  { %2088 = vmatpush.bf16.msra.mxu2 %v3214_v9  ;;  %2050 = vmatpush.bf16.msrb.mxu3 %v3322_v12  ;;  %v2945_v9 = vld [vmem:[#allocation5 + $0xc8] sm:$0xf]  ;;  %v3225_v12 = vld [vmem:[#allocation5 + $0x300] sm:$0xf] }
 0x10d   :  { %2064 = vmatpush.bf16.msra.mxu0 %v2926_v13  ;;  %v3535_v13 = vld [vmem:[#allocation5 + $0x144] sm:$0xf]  ;;  %v2946_v25 = vor.u32 %v3522_v11, %v2945_v9  ;;  %v3057_v9 = vld [vmem:[#allocation5 + $0x1a8] sm:$0xf] }
 0x10e   :  { %2077 = vmatpush.bf16.msra.mxu1 %v3054_v52  ;;  %v3006_v16 = vor.u32 %v3535_v13, %v3003_v14  ;;  %v3601_v52 = vld [vmem:[#allocation5 + $0x34c] sm:$0xf0]  ;;  %v3599_v11 = vld [vmem:[#allocation5 + $0x344] sm:$0xf] }
 0x10f   :  { %v3258_v53 = vor.u32 %v3601_v52, %v3257_v51  ;;  %v3593_v13 = vld [vmem:[#allocation5 + $0x30c] sm:$0xf0]  ;;  %v3291_v51 = vld [vmem:[#allocation5 + $0x390] sm:$0xf0] }
 0x110   :  { %2089 = vmatpush.bf16.msra.mxu2 %v3198_v18  ;;  %2051 = vmatpush.bf16.msrb.mxu3 %v3306_v23  ;;  %v3226_v15 = vor.u32 %v3593_v13, %v3225_v12  ;;  %v3619_v18 = vld [vmem:[#allocation5 + $0x3e4] sm:$0xf]  ;;  %v3259_v12 = vld [vmem:[#allocation5 + $0x350] sm:$0xf0] }
 0x111   :  { %2065 = vmatpush.bf16.msra.mxu0 %v2910_v22 }
 0x112   :  { %2078 = vmatpush.bf16.msra.mxu1 %v3038_v28  ;;  %v3241_v28 = vld [vmem:[#allocation5 + $0x320] sm:$0xf] }
 0x113   :  { %v3242_v0 = vor.u32 %v3597_v61, %v3241_v28  ;;  %v3554_v61 = vld [vmem:[#allocation5 + $0x1d4] sm:$0xf0] }
 0x114   :  { %2090 = vmatpush.bf16.msra.mxu2 %v3182_v32  ;;  %v3323_v32 = vld [vmem:[#allocation5 + $0x3d0] sm:$0xf0] }
 0x115   :  { %2066 = vmatpush.bf16.msra.mxu0 %v2894_v33  ;;  %v3289_v33 = vld [vmem:[#allocation5 + $0x380] sm:$0xf] }
 0x116   :  { %2079 = vmatpush.bf16.msra.mxu1 %v3022_v5  ;;  %v3290_v36 = vor.u32 %v3609_v35, %v3289_v33  ;;  %v3118_v5 = vor.u32 %v3563_v2, %v3115_v3 }
 0x118   :  { %2052 = vmatpush.bf16.msrb.mxu3 %v3290_v36  ;;  %v2930_v36 = vor.u32 %v3518_v30, %v2929_v26  ;;  %v3243_v26 = vld [vmem:[#allocation5 + $0x330] sm:$0xf0]  ;;  %v2963_v30 = vld [vmem:[#allocation5 + $0xf8] sm:$0xf0] }
 0x119   :  { %2067 = vmatpush.bf16.msra.mxu0 %v2878_v43  ;;  %v3166_v43 = vor.u32 %v3575_v39, %v3163_v41  ;;  %v3514_v39 = vld [vmem:[#allocation5 + $0x94] sm:$0xf0]  ;;  %v3307_v41 = vld [vmem:[#allocation5 + $0x3b0] sm:$0xf0] }
 0x11a   :  { %2080 = vmatpush.bf16.msra.mxu1 %v3006_v16  ;;  %v3559_v16 = vld [vmem:[#allocation5 + $0x204] sm:$0xf] }
 0x11b   :  { %2091 = vmatpush.bf16.msra.mxu2 %v3166_v43  ;;  %v3102_v21 = vor.u32 %v3559_v16, %v3099_v17  ;;  %v3262_v16 = vor.u32 %v3599_v11, %v3259_v12  ;;  %v3169_v11 = vld [vmem:[#allocation5 + $0x288] sm:$0xf]  ;;  %v3578_v12 = vld [vmem:[#allocation5 + $0x294] sm:$0xf0] }
 0x11c   :  { %2053 = vmatpush.bf16.msrb.mxu3 %v3274_v47  ;;  %v2897_v47 = vld [vmem:[#allocation5 + $0x68] sm:$0xf] }
 0x11d   :  { %2068 = vmatpush.bf16.msra.mxu0 %v2862_v6 }
 0x11e   :  { %2081 = vmatpush.bf16.msra.mxu1 %v2990_v29 }
 0x11f   :  { %2092 = vmatpush.bf16.msra.mxu2 %v3150_v50  ;;  %v3558_v50 = vld [vmem:[#allocation5 + $0x1f4] sm:$0xf0] }
 0x120   :  { %v1025_v22 = vpop.f32.mrf.mxu0  ;;  %2054 = vmatpush.bf16.msrb.mxu3 %v3258_v53 }
 0x121   :  { %2069 = vmatpush.bf16.msra.mxu0 %v2846_v59  ;;  %v1038_v27 = vpop.f32.mrf.mxu1  ;;  %v1026_v42 = vadd.f32 %v1025_v22, %v368_v31  ;;  %v3339_v22 = vld [vmem:[#allocation5 + $0x3f0] sm:$0xf0]  ;;  %v3615_v31 = vld [vmem:[#allocation5 + $0x3c4] sm:$0xf] }
 0x122   :  { %2082 = vmatpush.bf16.msra.mxu1 %v2974_v40  ;;  %v3342_v24 = vor.u32 %v3619_v18, %v3339_v22  ;;  %v3326_v35 = vor.u32 %v3615_v31, %v3323_v32  ;;  %v3611_v40 = vld [vmem:[#allocation5 + $0x3a4] sm:$0xf]  ;;  %v3498_v22 = vld [vmem:[#allocation5 + $0x14] sm:$0xf0] }
 0x123   :  { %v1039_v6 = vadd.f32 %v1038_v27, %v1026_v42  ;;  %2093 = vmatpush.bf16.msra.mxu2 %v3134_v57  ;;  %v3310_v43 = vor.u32 %v3611_v40, %v3307_v41  ;;  %v3090_v57 = vor.u32 %v3558_v50, %v3089_v49  ;;  %v3217_v41 = vld [vmem:[#allocation5 + $0x2e8] sm:$0xf] }
 0x124   :  { %2055 = vmatpush.bf16.msrb.mxu3 %v3242_v0 }
 0x127   :  { %2094 = vmatpush.bf16.msra.mxu2 %v3118_v5  ;;  %v3074_v5 = vor.u32 %v3554_v61, %v3073_v60 }
 0x128   :  { %v1027_v46 = vpop.f32.mrf.mxu0  ;;  %2056 = vmatpush.bf16.msrb.mxu3 %v3226_v15 }
 0x129   :  { %v1040_v1 = vpop.f32.mrf.mxu1  ;;  %v2914_v46 = vor.u32 %v3514_v39, %v2913_v37  ;;  %v3542_v39 = vld [vmem:[#allocation5 + $0x174] sm:$0xf0] }
 0x12b   :  { %2095 = vmatpush.bf16.msra.mxu2 %v3102_v21  ;;  %v2849_v21 = vld [vmem:[#allocation5 + $0x8] sm:$0xf] }
 0x12c   :  { %2101 = vmatpush.bf16.msra.mxu3 %v3342_v24  ;;  %v3546_v24 = vld [vmem:[#allocation5 + $0x194] sm:$0xf0] }
 0x12e   :  { %v1051_v56 = vpop.f32.mrf.mxu2 }
 0x12f   :  { %v1052_v58 = vadd.f32 %v1051_v56, %v1039_v6  ;;  %v1064_v59 = vpop.f32.mrf.mxu3  ;;  %v3607_v6 = vld [vmem:[#allocation5 + $0x384] sm:$0xf]  ;;  %v2898_v56 = vor.u32 %v3510_v48, %v2897_v47  ;;  %v2947_v47 = vld [vmem:[#allocation5 + $0xd8] sm:$0xf0] }
 0x130   :  { %v1077_v34 = vpop.f32.mrf.mxu0  ;;  %2102 = vmatpush.bf16.msra.mxu3 %v3326_v35  ;;  %v3294_v53 = vor.u32 %v3607_v6, %v3291_v51  ;;  %v3009_v51 = vld [vmem:[#allocation5 + $0x148] sm:$0xf] }
 0x131   :  { %v1065_v62 = vadd.f32 %v1064_v59, %v1052_v58  ;;  %v1090_v4 = vpop.f32.mrf.mxu1  ;;  %v1078_v27 = vadd.f32 %v1077_v34, %v369_v8  ;;  %v2881_v58 = vld [vmem:[#allocation5 + $0x48] sm:$0xf]  ;;  %v3506_v59 = vld [vmem:[#allocation5 + $0x54] sm:$0xf0]  ;;  %v3275_v34 = vld [vmem:[#allocation5 + $0x370] sm:$0xf0] }
 0x132   :  { %v3502_v8 = vld [vmem:[#allocation5 + $0x34] sm:$0xf0] }
 0x133   :  { %v1224_v7 = vmax.f32 %v1065_v62, 0.0  ;;  %v1091_v38 = vadd.f32 %v1090_v4, %v1078_v27  ;;  %v3603_v62 = vld [vmem:[#allocation5 + $0x364] sm:$0xf]  ;;  %v2882_v4 = vor.u32 %v3506_v59, %v2881_v58 }
 0x134   :  { %2103 = vmatpush.bf16.msra.mxu3 %v3310_v43  ;;  %v3278_v2 = vor.u32 %v3603_v62, %v3275_v34  ;;  %v3227_v43 = vld [vmem:[#allocation5 + $0x310] sm:$0xf0]  ;;  %v2993_v34 = vld [vmem:[#allocation5 + $0x128] sm:$0xf] }
 0x135   :  { %v3880_v14 = vpack.c.bf16 %v1224_v7, %v1224_v7  ;;  %v2865_v7 = vld [vmem:[#allocation5 + $0x28] sm:$0xf] }
 0x136   :  { %v1053_v20 = vpop.f32.mrf.mxu2  ;;  %v2866_v18 = vor.u32 %v3502_v8, %v2865_v7 }
 0x137   :  { %v1066_v23 = vpop.f32.mrf.mxu3  ;;  %2018 = vmatmul.bf16.vlgmr.msrb.gmra.mxu0 %v3880_v14 }
 0x138   :  { %2114 = vmatpush.bf16.msrb.mxu0 %v2962_v10  ;;  %v1079_v29 = vpop.f32.mrf.mxu0  ;;  %2104 = vmatpush.bf16.msra.mxu3 %v3294_v53  ;;  %v3550_v10 = vld [vmem:[#allocation5 + $0x1b4] sm:$0xf0]  ;;  %v3041_v23 = vld [vmem:[#allocation5 + $0x188] sm:$0xf] }
 0x139   :  { %v1092_v33 = vpop.f32.mrf.mxu1  ;;  %v3058_v20 = vor.u32 %v3550_v10, %v3057_v9  ;;  %v3524_v29 = vld [vmem:[#allocation5 + $0xec] sm:$0xf]  ;;  %v3042_v37 = vor.u32 %v3546_v24, %v3041_v23  ;;  %v3201_v53 = vld [vmem:[#allocation5 + $0x2c8] sm:$0xf]  ;;  %v3530_v10 = vld [vmem:[#allocation5 + $0x114] sm:$0xf0]  ;;  %v3170_v23 = vor.u32 %v3578_v12, %v3169_v11 }
 0x13a   :  { %v2966_v40 = vor.u32 %v3524_v29, %v2963_v30  ;;  %v2977_v9 = vld [vmem:[#allocation5 + $0x108] sm:$0xf]  ;;  %v3504_v29 = vld [vmem:[#allocation5 + $0x4c] sm:$0xf]  ;;  %v2883_v30 = vld [vmem:[#allocation5 + $0x58] sm:$0xf0] }
 0x13b   :  { %v3329_v12 = vld [vmem:[#allocation5 + $0x3c8] sm:$0xf] }
 0x13c   :  { %2115 = vmatpush.bf16.msrb.mxu0 %v2946_v25  ;;  %2105 = vmatpush.bf16.msra.mxu3 %v3278_v2  ;;  %v3595_v25 = vld [vmem:[#allocation5 + $0x324] sm:$0xf]  ;;  %v3582_v2 = vld [vmem:[#allocation5 + $0x2b4] sm:$0xf0] }
 0x13d   :  { %v3246_v31 = vor.u32 %v3595_v25, %v3243_v26  ;;  %v3153_v25 = vld [vmem:[#allocation5 + $0x268] sm:$0xf] }
 0x13e   :  { %v1103_v42 = vpop.f32.mrf.mxu2 }
 0x13f   :  { %v1104_v44 = vadd.f32 %v1103_v42, %v1091_v38  ;;  %v1116_v45 = vpop.f32.mrf.mxu3  ;;  %v3025_v38 = vld [vmem:[#allocation5 + $0x168] sm:$0xf]  ;;  %v3591_v42 = vld [vmem:[#allocation5 + $0x304] sm:$0xf] }
 0x140   :  { %2116 = vmatpush.bf16.msrb.mxu0 %v2930_v36  ;;  %2106 = vmatpush.bf16.msra.mxu3 %v3262_v16  ;;  %v2850_v36 = vor.u32 %v3498_v22, %v2849_v21  ;;  %v3230_v48 = vor.u32 %v3591_v42, %v3227_v43  ;;  %v2978_v21 = vor.u32 %v3530_v10, %v2977_v9  ;;  %v371_v22 = vperm.slane %v3876_v19, 3  ;;  %v3548_v42 = vld [vmem:[#allocation5 + $0x1ac] sm:$0xf]  ;;  %v3059_v43 = vld [vmem:[#allocation5 + $0x1b8] sm:$0xf0] }
 0x141   :  { %v1117_v1 = vadd.f32 %v1116_v45, %v1104_v44  ;;  %v1129_v52 = vpop.f32.mrf.mxu0  ;;  %v3590_v45 = vld [vmem:[#allocation5 + $0x2f4] sm:$0xf0] }
 0x142   :  { %v1130_v13 = vadd.f32 %v1129_v52, %v370_v63  ;;  %v3218_v50 = vor.u32 %v3590_v45, %v3217_v41  ;;  %v3538_v52 = vld [vmem:[#allocation5 + $0x154] sm:$0xf0] }
 0x143   :  { %v1225_v54 = vmax.f32 %v1117_v1, 0.0  ;;  %v3026_v1 = vor.u32 %v3542_v39, %v3025_v38  ;;  %v3010_v60 = vor.u32 %v3538_v52, %v3009_v51  ;;  %v3534_v63 = vld [vmem:[#allocation5 + $0x134] sm:$0xf0]  ;;  %v3500_v39 = vld [vmem:[#allocation5 + $0x2c] sm:$0xf] }
 0x144   :  { %v1142_v55 = vpop.f32.mrf.mxu1  ;;  %2117 = vmatpush.bf16.msrb.mxu0 %v2914_v46  ;;  %2107 = vmatpush.bf16.msra.mxu3 %v3246_v31  ;;  %v3520_v46 = vld [vmem:[#allocation5 + $0xcc] sm:$0xf]  ;;  %v3570_v38 = vld [vmem:[#allocation5 + $0x254] sm:$0xf0] }
 0x145   :  { %v3883_v28 = vpack.c.bf16 %v1225_v54, %v1225_v54  ;;  %v1143_v27 = vadd.f32 %v1142_v55, %v1130_v13  ;;  %v2950_v6 = vor.u32 %v3520_v46, %v2947_v47  ;;  %v3586_v55 = vld [vmem:[#allocation5 + $0x2d4] sm:$0xf0]  ;;  %v3508_v13 = vld [vmem:[#allocation5 + $0x6c] sm:$0xf]  ;;  %v3121_v47 = vld [vmem:[#allocation5 + $0x228] sm:$0xf] }
 0x146   :  { %v1105_v0 = vpop.f32.mrf.mxu2  ;;  %v3202_v61 = vor.u32 %v3586_v55, %v3201_v53  ;;  %v3552_v31 = vld [vmem:[#allocation5 + $0x1cc] sm:$0xf]  ;;  %v3043_v53 = vld [vmem:[#allocation5 + $0x198] sm:$0xf0] }
 0x147   :  { %v1118_v3 = vpop.f32.mrf.mxu3  ;;  %2031 = vmatmul.bf16.vlgmr.msrb.gmra.mxu1 %v3883_v28  ;;  %2070 = vmatmul.bf16.vlgmr.msra.gmra.mxu0 %v3880_v14  ;;  %v3185_v0 = vld [vmem:[#allocation5 + $0x2a8] sm:$0xf]  ;;  %v3544_v52 = vld [vmem:[#allocation5 + $0x18c] sm:$0xf] }
 0x148   :  { %2118 = vmatpush.bf16.msrb.mxu0 %v2898_v56  ;;  %2127 = vmatpush.bf16.msrb.mxu1 %v3090_v57  ;;  %v3516_v56 = vld [vmem:[#allocation5 + $0xac] sm:$0xf]  ;;  %v2931_v57 = vld [vmem:[#allocation5 + $0xb8] sm:$0xf0]  ;;  %v3186_v7 = vor.u32 %v3582_v2, %v3185_v0 }
 0x149   :  { %v1131_v15 = vpop.f32.mrf.mxu0  ;;  %2108 = vmatpush.bf16.msra.mxu3 %v3230_v48  ;;  %v2934_v62 = vor.u32 %v3516_v56, %v2931_v57  ;;  %v3512_v3 = vld [vmem:[#allocation5 + $0x8c] sm:$0xf]  ;;  %v3027_v2 = vld [vmem:[#allocation5 + $0x178] sm:$0xf0] }
 0x14a   :  { %v2899_v15 = vld [vmem:[#allocation5 + $0x78] sm:$0xf0]  ;;  %v3540_v0 = vld [vmem:[#allocation5 + $0x16c] sm:$0xf] }
 0x14b   :  { %v2902_v24 = vor.u32 %v3508_v13, %v2899_v15  ;;  %v3030_v10 = vor.u32 %v3540_v0, %v3027_v2  ;;  %v3618_v13 = vld [vmem:[#allocation5 + $0x3d4] sm:$0xf0]  ;;  %v3536_v15 = vld [vmem:[#allocation5 + $0x14c] sm:$0xf]  ;;  %v3347_v0 = vld [vmem:[#allocation5 + $0x3f8] sm:$0xf0] }
 0x14c   :  { %v1144_v17 = vpop.f32.mrf.mxu1  ;;  %2119 = vmatpush.bf16.msrb.mxu0 %v2882_v4  ;;  %2128 = vmatpush.bf16.msrb.mxu1 %v3074_v5  ;;  %v2915_v4 = vld [vmem:[#allocation5 + $0x98] sm:$0xf0]  ;;  %v2994_v5 = vor.u32 %v3534_v63, %v2993_v34  ;;  %v3345_v34 = vld [vmem:[#allocation5 + $0x3e8] sm:$0xf]  ;;  %v3622_v63 = vld [vmem:[#allocation5 + $0x3f4] sm:$0xf0] }
 0x14d   :  { %v2918_v8 = vor.u32 %v3512_v3, %v2915_v4  ;;  %v3556_v17 = vld [vmem:[#allocation5 + $0x1ec] sm:$0xf]  ;;  %v3219_v4 = vld [vmem:[#allocation5 + $0x2f8] sm:$0xf0] }
 0x14e   :  { %v1155_v32 = vpop.f32.mrf.mxu2  ;;  %v3588_v3 = vld [vmem:[#allocation5 + $0x2ec] sm:$0xf] }
 0x14f   :  { %v1168_v33 = vpop.f32.mrf.mxu3  ;;  %v1156_v35 = vadd.f32 %v1155_v32, %v1143_v27  ;;  %v3574_v27 = vld [vmem:[#allocation5 + $0x274] sm:$0xf0]  ;;  %v3075_v32 = vld [vmem:[#allocation5 + $0x1d8] sm:$0xf0]  ;;  %v3222_v11 = vor.u32 %v3588_v3, %v3219_v4  ;;  %v3616_v4 = vld [vmem:[#allocation5 + $0x3cc] sm:$0xf] }
 0x150   :  { %2120 = vmatpush.bf16.msrb.mxu0 %v2866_v18  ;;  %2129 = vmatpush.bf16.msrb.mxu1 %v3058_v20  ;;  %v3091_v18 = vld [vmem:[#allocation5 + $0x1f8] sm:$0xf0]  ;;  %v3078_v19 = vor.u32 %v3552_v31, %v3075_v32 }
 0x151   :  { %v1169_v44 = vadd.f32 %v1168_v33, %v1156_v35  ;;  %v3094_v26 = vor.u32 %v3556_v17, %v3091_v18  ;;  %v3154_v33 = vor.u32 %v3574_v27, %v3153_v25  ;;  %v2886_v35 = vor.u32 %v3504_v29, %v2883_v30  ;;  %v3011_v17 = vld [vmem:[#allocation5 + $0x158] sm:$0xf0]  ;;  %v3584_v18 = vld [vmem:[#allocation5 + $0x2cc] sm:$0xf]  ;;  %v3313_v25 = vld [vmem:[#allocation5 + $0x3a8] sm:$0xf] }
 0x152   :  { %v3532_v27 = vld [vmem:[#allocation5 + $0x12c] sm:$0xf]  ;;  %v2995_v29 = vld [vmem:[#allocation5 + $0x138] sm:$0xf0] }
 0x153   :  { %v1226_v49 = vmax.f32 %v1169_v44, 0.0  ;;  %v3580_v30 = vld [vmem:[#allocation5 + $0x2ac] sm:$0xf]  ;;  %v3187_v31 = vld [vmem:[#allocation5 + $0x2b8] sm:$0xf0] }
 0x154   :  { %2121 = vmatpush.bf16.msrb.mxu0 %v2850_v36  ;;  %2130 = vmatpush.bf16.msrb.mxu1 %v3042_v37  ;;  %v3137_v36 = vld [vmem:[#allocation5 + $0x248] sm:$0xf] }
 0x155   :  { %v3888_v54 = vpack.c.bf16 %v1226_v49, %v1226_v49  ;;  %v3138_v45 = vor.u32 %v3570_v38, %v3137_v36  ;;  %v3062_v49 = vor.u32 %v3548_v42, %v3059_v43  ;;  %v3610_v36 = vld [vmem:[#allocation5 + $0x394] sm:$0xf0]  ;;  %v3576_v38 = vld [vmem:[#allocation5 + $0x28c] sm:$0xf]  ;;  %v3281_v43 = vld [vmem:[#allocation5 + $0x368] sm:$0xf] }
 0x156   :  { %v1157_v58 = vpop.f32.mrf.mxu2 }
 0x157   :  { %v1170_v59 = vpop.f32.mrf.mxu3  ;;  %2083 = vmatmul.bf16.vlgmr.msra.gmra.mxu1 %v3883_v28  ;;  %2122 = vmatmul.bf16.vlgmr.msrb.gmra.mxu0 %v3880_v14 }
 0x158   :  { %2166 = vmatpush.bf16.msra.mxu0 %v2966_v40  ;;  %2044 = vmatmul.bf16.vlgmr.msrb.gmra.mxu2 %v3888_v54  ;;  %v2867_v40 = vld [vmem:[#allocation5 + $0x38] sm:$0xf0]  ;;  %v3105_v59 = vld [vmem:[#allocation5 + $0x208] sm:$0xf] }
 0x159   :  { %2131 = vmatpush.bf16.msrb.mxu1 %v3026_v1  ;;  %2140 = vmatpush.bf16.msrb.mxu2 %v3218_v50  ;;  %v2870_v46 = vor.u32 %v3500_v39, %v2867_v40  ;;  %v3566_v1 = vld [vmem:[#allocation5 + $0x234] sm:$0xf0]  ;;  %v3496_v50 = vld [vmem:[#allocation5 + $0xc] sm:$0xf]  ;;  %v3171_v39 = vld [vmem:[#allocation5 + $0x298] sm:$0xf0] }
 0x15a   :  { %v3122_v57 = vor.u32 %v3566_v1, %v3121_v47  ;;  %v3174_v42 = vor.u32 %v3576_v38, %v3171_v39  ;;  %v3602_v1 = vld [vmem:[#allocation5 + $0x354] sm:$0xf0] }
 0x15c   :  { %2167 = vmatpush.bf16.msra.mxu0 %v2950_v6  ;;  %v2851_v6 = vld [vmem:[#allocation5 + $0x18] sm:$0xf0] }
 0x15d   :  { %2132 = vmatpush.bf16.msrb.mxu1 %v3010_v60  ;;  %2141 = vmatpush.bf16.msrb.mxu2 %v3202_v61  ;;  %v2854_v58 = vor.u32 %v3496_v50, %v2851_v6  ;;  %v3562_v60 = vld [vmem:[#allocation5 + $0x214] sm:$0xf0]  ;;  %v3568_v50 = vld [vmem:[#allocation5 + $0x24c] sm:$0xf]  ;;  %v3139_v6 = vld [vmem:[#allocation5 + $0x258] sm:$0xf0] }
 0x160   :  { %2168 = vmatpush.bf16.msra.mxu0 %v2934_v62  ;;  %v3046_v62 = vor.u32 %v3544_v52, %v3043_v53  ;;  %v3142_v52 = vor.u32 %v3568_v50, %v3139_v6  ;;  %v3249_v53 = vld [vmem:[#allocation5 + $0x328] sm:$0xf] }
 0x161   :  { %v1181_v16 = vpop.f32.mrf.mxu0  ;;  %2133 = vmatpush.bf16.msrb.mxu1 %v2994_v5  ;;  %2142 = vmatpush.bf16.msrb.mxu2 %v3186_v7  ;;  %v3106_v7 = vor.u32 %v3562_v60, %v3105_v59  ;;  %v3233_v60 = vld [vmem:[#allocation5 + $0x308] sm:$0xf] }
 0x162   :  { %v1182_v37 = vadd.f32 %v1181_v16, %v371_v22  ;;  %v3330_v22 = vor.u32 %v3618_v13, %v3329_v12  ;;  %v3608_v12 = vld [vmem:[#allocation5 + $0x38c] sm:$0xf]  ;;  %v3299_v13 = vld [vmem:[#allocation5 + $0x398] sm:$0xf0] }
 0x164   :  { %v1194_v20 = vpop.f32.mrf.mxu1  ;;  %2169 = vmatpush.bf16.msra.mxu0 %v2918_v8  ;;  %v3346_v8 = vor.u32 %v3622_v63, %v3345_v34  ;;  %v3107_v34 = vld [vmem:[#allocation5 + $0x218] sm:$0xf0]  ;;  %v3620_v63 = vld [vmem:[#allocation5 + $0x3ec] sm:$0xf] }
 0x165   :  { %2134 = vmatpush.bf16.msrb.mxu1 %v2978_v21  ;;  %2143 = vmatpush.bf16.msrb.mxu2 %v3170_v23  ;;  %v1195_v48 = vadd.f32 %v1194_v20, %v1182_v37  ;;  %v3203_v20 = vld [vmem:[#allocation5 + $0x2d8] sm:$0xf0]  ;;  %v3014_v23 = vor.u32 %v3536_v15, %v3011_v17  ;;  %v3528_v37 = vld [vmem:[#allocation5 + $0x10c] sm:$0xf]  ;;  %v3350_v3 = vor.u32 %v3620_v63, %v3347_v0 }
 0x166   :  { %v3302_v15 = vor.u32 %v3608_v12, %v3299_v13  ;;  %v3283_v17 = vld [vmem:[#allocation5 + $0x378] sm:$0xf0] }
 0x168   :  { %2170 = vmatpush.bf16.msra.mxu0 %v2902_v24  ;;  %2135 = vmatmul.bf16.vlgmr.msrb.gmra.mxu1 %v3883_v28  ;;  %v3206_v24 = vor.u32 %v3584_v18, %v3203_v20  ;;  %v3600_v20 = vld [vmem:[#allocation5 + $0x34c] sm:$0xf] }
 0x169   :  { %2179 = vmatpush.bf16.msra.mxu1 %v3094_v26  ;;  %v1183_v41 = vpop.f32.mrf.mxu0  ;;  %2096 = vmatmul.bf16.vlgmr.msra.gmra.mxu2 %v3888_v54  ;;  %v3614_v26 = vld [vmem:[#allocation5 + $0x3b4] sm:$0xf0] }
 0x16a   :  { %2144 = vmatpush.bf16.msrb.mxu2 %v3154_v33  ;;  %v3314_v32 = vor.u32 %v3614_v26, %v3313_v25  ;;  %v3190_v33 = vor.u32 %v3580_v30, %v3187_v31  ;;  %v3592_v26 = vld [vmem:[#allocation5 + $0x30c] sm:$0xf]  ;;  %v3909_v30 = vld [vmem:[%s3927_s6] sm:$0xf] }
 0x16b   :  { %v1363_v38 = vperm.slane %v3909_v30, 1 }
 0x16c   :  { %v1196_v44 = vpop.f32.mrf.mxu1  ;;  %2171 = vmatpush.bf16.msra.mxu0 %v2886_v35  ;;  %v3297_v35 = vld [vmem:[#allocation5 + $0x388] sm:$0xf] }
 0x16d   :  { %2180 = vmatpush.bf16.msra.mxu1 %v3078_v19  ;;  %v2979_v19 = vld [vmem:[#allocation5 + $0x118] sm:$0xf0]  ;;  %v3298_v40 = vor.u32 %v3610_v36, %v3297_v35  ;;  %v3606_v44 = vld [vmem:[#allocation5 + $0x374] sm:$0xf0] }
 0x16e   :  { %v1207_v51 = vpop.f32.mrf.mxu2  ;;  %2145 = vmatpush.bf16.msrb.mxu2 %v3138_v45  ;;  %v2982_v41 = vor.u32 %v3528_v37, %v2979_v19  ;;  %v3572_v45 = vld [vmem:[#allocation5 + $0x26c] sm:$0xf]  ;;  %v3282_v47 = vor.u32 %v3606_v44, %v3281_v43 }
 0x16f   :  { %v1208_v55 = vadd.f32 %v1207_v51, %v1195_v48  ;;  %v1220_v56 = vpop.f32.mrf.mxu3 }
 0x170   :  { %2172 = vmatpush.bf16.msra.mxu0 %v2870_v46  ;;  %v3155_v46 = vld [vmem:[#allocation5 + $0x278] sm:$0xf0] }
 0x171   :  { %v1221_v61 = vadd.f32 %v1220_v56, %v1208_v55  ;;  %2181 = vmatpush.bf16.msra.mxu1 %v3062_v49  ;;  %v3158_v48 = vor.u32 %v3572_v45, %v3155_v46  ;;  %v3265_v49 = vld [vmem:[#allocation5 + $0x348] sm:$0xf]  ;;  %v3598_v55 = vld [vmem:[#allocation5 + $0x334] sm:$0xf0]  ;;  %v3564_v56 = vld [vmem:[#allocation5 + $0x22c] sm:$0xf] }
 0x172   :  { %2146 = vmatpush.bf16.msrb.mxu2 %v3122_v57  ;;  %v3266_v51 = vor.u32 %v3602_v1, %v3265_v49  ;;  %v3123_v57 = vld [vmem:[#allocation5 + $0x238] sm:$0xf0]  ;;  %v1364_v46 = vperm.slane %v3909_v30, 2 }
 0x173   :  { %v1227_v5 = vmax.f32 %v1221_v61, 0.0  ;;  %v3126_v59 = vor.u32 %v3564_v56, %v3123_v57  ;;  %v3594_v61 = vld [vmem:[#allocation5 + $0x314] sm:$0xf0] }
 0x174   :  { %2173 = vmatpush.bf16.msra.mxu0 %v2854_v58  ;;  %v3250_v58 = vor.u32 %v3598_v55, %v3249_v53  ;;  %v3234_v2 = vor.u32 %v3594_v61, %v3233_v60 }
 0x175   :  { %v3896_v9 = vpack.c.bf16 %v1227_v5, %v1227_v5  ;;  %2182 = vmatpush.bf16.msra.mxu1 %v3046_v62  ;;  %v3560_v62 = vld [vmem:[#allocation5 + $0x20c] sm:$0xf]  ;;  %v3331_v5 = vld [vmem:[#allocation5 + $0x3d8] sm:$0xf0] }
 0x176   :  { %v1209_v16 = vpop.f32.mrf.mxu2  ;;  %2147 = vmatpush.bf16.msrb.mxu2 %v3106_v7  ;;  %v3334_v7 = vor.u32 %v3616_v4, %v3331_v5 }
 0x177   :  { %v1222_v21 = vpop.f32.mrf.mxu3  ;;  %2057 = vmatmul.bf16.vlgmr.msrb.gmra.mxu3 %v3896_v9  ;;  %2174 = vmatmul.bf16.vlgmr.msra.gmra.mxu0 %v3880_v14  ;;  %v2998_v14 = vor.u32 %v3532_v27, %v2995_v29  ;;  %v3604_v16 = vld [vmem:[#allocation5 + $0x36c] sm:$0xf] }
 0x178   :  { %2153 = vmatpush.bf16.msrb.mxu3 %v3346_v8  ;;  %v3612_v8 = vld [vmem:[#allocation5 + $0x3ac] sm:$0xf]  ;;  %v3286_v18 = vor.u32 %v3604_v16, %v3283_v17  ;;  %v3267_v21 = vld [vmem:[#allocation5 + $0x358] sm:$0xf0] }
 0x179   :  { %2183 = vmatpush.bf16.msra.mxu1 %v3030_v10  ;;  %2148 = vmatmul.bf16.vlgmr.msrb.gmra.mxu2 %v3888_v54  ;;  %v3315_v10 = vld [vmem:[#allocation5 + $0x3b8] sm:$0xf0] }
 0x17a   :  { %2192 = vmatpush.bf16.msra.mxu2 %v3222_v11  ;;  %v3318_v11 = vor.u32 %v3612_v8, %v3315_v10 }
 0x17c   :  { %2154 = vmatpush.bf16.msrb.mxu3 %v3330_v22  ;;  %v3270_v22 = vor.u32 %v3600_v20, %v3267_v21 }
 0x17d   :  { %2184 = vmatpush.bf16.msra.mxu1 %v3014_v23  ;;  %v3596_v23 = vld [vmem:[#allocation5 + $0x32c] sm:$0xf] }
 0x17e   :  { %2193 = vmatpush.bf16.msra.mxu2 %v3206_v24  ;;  %v3251_v24 = vld [vmem:[#allocation5 + $0x338] sm:$0xf0] }
 0x17f   :  { %v3254_v25 = vor.u32 %v3596_v23, %v3251_v24 }
 0x180   :  { %2155 = vmatpush.bf16.msrb.mxu3 %v3314_v32  ;;  %v1362_v32 = vperm.slane %v3909_v30, 0 }
 0x181   :  { %2185 = vmatpush.bf16.msra.mxu1 %v2998_v14 }
 0x182   :  { %2194 = vmatpush.bf16.msra.mxu2 %v3190_v33 }
 0x184   :  { %2156 = vmatpush.bf16.msrb.mxu3 %v3298_v40 }
 0x185   :  { %2186 = vmatpush.bf16.msra.mxu1 %v2982_v41 }
 0x186   :  { %2195 = vmatpush.bf16.msra.mxu2 %v3174_v42 }
 0x187   :  { %2109 = vmatmul.bf16.vlgmr.msra.gmra.mxu3 %v3896_v9 }
 0x188   :  { %2157 = vmatpush.bf16.msrb.mxu3 %v3282_v47  ;;  %2187 = vmatmul.bf16.vlgmr.msra.gmra.mxu1 %v3883_v28  ;;  %v3110_v28 = vor.u32 %v3560_v62, %v3107_v34 }
 0x18a   :  { %2196 = vmatpush.bf16.msra.mxu2 %v3158_v48 }
 0x18c   :  { %2158 = vmatpush.bf16.msrb.mxu3 %v3266_v51 }
 0x18e   :  { %2197 = vmatpush.bf16.msra.mxu2 %v3142_v52 }
 0x190   :  { %2159 = vmatpush.bf16.msrb.mxu3 %v3250_v58  ;;  %v2222_v58 = vld [vmem:[%s3928_s7] sm:$0xf] }
 0x191   :  { %v2223_v60 = vunpack.c.l.bf16 %v2222_v58 }
 0x192   :  { %2198 = vmatpush.bf16.msra.mxu2 %v3126_v59 }
 0x193   :  { %v2225_v63 = vperm.slane %v2223_v60, 0  ;;  %v2226_v0 = vperm.slane %v2223_v60, 2 }
 0x194   :  { %2160 = vmatpush.bf16.msrb.mxu3 %v3234_v2 }
 0x195   :  { %v2234_v5 = vperm.slane %v2226_v0, 0 }
 0x196   :  { %2199 = vmatpush.bf16.msra.mxu2 %v3110_v28 }
 0x197   :  { %2161 = vmatmul.bf16.vlgmr.msrb.gmra.mxu3 %v3896_v9 }
 0x198   :  { %2205 = vmatpush.bf16.msra.mxu3 %v3350_v3  ;;  %v2233_v3 = vperm.slane %v2225_v63, 0 }
 0x199   :  { %2200 = vmatmul.bf16.vlgmr.msra.gmra.mxu2 %v3888_v54  ;;  %v3235_v54 = vld [vmem:[#allocation5 + $0x318] sm:$0xf0] }
 0x19a   :  { %v3238_v27 = vor.u32 %v3592_v26, %v3235_v54  ;;  %v1365_v54 = vperm.slane %v3909_v30, 3 }
 0x19c   :  { %2206 = vmatpush.bf16.msra.mxu3 %v3334_v7 }
 0x1a0   :  { %2207 = vmatpush.bf16.msra.mxu3 %v3318_v11 }
 0x1a4   :  { %2208 = vmatpush.bf16.msra.mxu3 %v3302_v15  ;;  %v2227_v15 = vperm.slane %v2223_v60, 4 }
 0x1a6   :  { %v2235_v20 = vperm.slane %v2227_v15, 0 }
 0x1a8   :  { %2209 = vmatpush.bf16.msra.mxu3 %v3286_v18 }
 0x1ac   :  { %2210 = vmatpush.bf16.msra.mxu3 %v3270_v22 }
 0x1b0   :  { %2211 = vmatpush.bf16.msra.mxu3 %v3254_v25 }
 0x1b4   :  { %2212 = vmatpush.bf16.msra.mxu3 %v3238_v27  ;;  %v2019_v29 = vpop.f32.mrf.mxu0 }
 0x1b5   :  { %v2020_v14 = vadd.f32 %v2019_v29, %v1362_v32 }
 0x1b7   :  { %2213 = vmatmul.bf16.vlgmr.msra.gmra.mxu3 %v3896_v9 }
 0x1bc   :  { %v2021_v31 = vpop.f32.mrf.mxu0 }
 0x1bd   :  { %v2228_v31 = vperm.slane %v2223_v60, 6 }
 0x1c4   :  { %v2032_v33 = vpop.f32.mrf.mxu1  ;;  %v2071_v35 = vpop.f32.mrf.mxu0 }
 0x1c5   :  { %v2033_v36 = vadd.f32 %v2032_v33, %v2020_v14  ;;  %v2072_v39 = vadd.f32 %v2071_v35, %v1363_v38  ;;  %v2236_v35 = vperm.slane %v2228_v31, 0 }
 0x1cc   :  { %v2034_v37 = vpop.f32.mrf.mxu1  ;;  %v2073_v19 = vpop.f32.mrf.mxu0 }
 0x1d4   :  { %v2084_v40 = vpop.f32.mrf.mxu1  ;;  %v2123_v9 = vpop.f32.mrf.mxu0 }
 0x1d5   :  { %v2085_v41 = vadd.f32 %v2084_v40, %v2072_v39  ;;  %v2124_v47 = vadd.f32 %v2123_v9, %v1364_v46  ;;  %v3627_v39 = vld [vmem:[#allocation2] ss:$0 sm:$0xff] }
 0x1db   :  { %v2045_v42 = vpop.f32.mrf.mxu2 }
 0x1dc   :  { %v2046_v43 = vadd.f32 %v2045_v42, %v2033_v36  ;;  %v2086_v44 = vpop.f32.mrf.mxu1  ;;  %v2125_v45 = vpop.f32.mrf.mxu0 }
 0x1e3   :  { %v2047_v48 = vpop.f32.mrf.mxu2 }
 0x1e5   :  { %v2136_v49 = vpop.f32.mrf.mxu1 }
 0x1e6   :  { %v2137_v1 = vadd.f32 %v2136_v49, %v2124_v47 }
 0x1ec   :  { %v2097_v50 = vpop.f32.mrf.mxu2 }
 0x1ed   :  { %v2098_v6 = vadd.f32 %v2097_v50, %v2085_v41  ;;  %v2138_v51 = vpop.f32.mrf.mxu1 }
 0x1f4   :  { %v2175_v52 = vpop.f32.mrf.mxu0  ;;  %v2099_v53 = vpop.f32.mrf.mxu2 }
 0x1f5   :  { %v2176_v27 = vadd.f32 %v2175_v52, %v1365_v54 }
 0x1fa   :  { %v2058_v55 = vpop.f32.mrf.mxu3 }
 0x1fb   :  { %v2059_v34 = vadd.f32 %v2058_v55, %v2046_v43 }
 0x1fc   :  { %v2177_v56 = vpop.f32.mrf.mxu0  ;;  %v2149_v57 = vpop.f32.mrf.mxu2 }
 0x1fd   :  { %v2218_v28 = vmax.f32 %v2059_v34, 0.0  ;;  %v2150_v16 = vadd.f32 %v2149_v57, %v2137_v1 }
 0x1ff   :  { %v2237_v10 = vmul.f32 %v2233_v3, %v2218_v28 }
 0x202   :  { %v2060_v59 = vpop.f32.mrf.mxu3 }
 0x204   :  { %v2151_v62 = vpop.f32.mrf.mxu2 }
 0x205   :  { %v2188_v61 = vpop.f32.mrf.mxu1 }
 0x206   :  { %v2189_v29 = vadd.f32 %v2188_v61, %v2176_v27 }
 0x20a   :  { %v2110_v2 = vpop.f32.mrf.mxu3 }
 0x20b   :  { %v2111_v4 = vadd.f32 %v2110_v2, %v2098_v6 }
 0x20d   :  { %v2219_v7 = vmax.f32 %v2111_v4, 0.0  ;;  %v2190_v8 = vpop.f32.mrf.mxu1 }
 0x20f   :  { %v2238_v11 = vmul.f32 %v2234_v5, %v2219_v7 }
 0x211   :  { %v2241_v12 = vadd.f32 %v2238_v11, %v2237_v10 }
 0x212   :  { %v2112_v13 = vpop.f32.mrf.mxu3 }
 0x21a   :  { %v2162_v17 = vpop.f32.mrf.mxu3 }
 0x21b   :  { %v2163_v18 = vadd.f32 %v2162_v17, %v2150_v16 }
 0x21c   :  { %v2201_v21 = vpop.f32.mrf.mxu2 }
 0x21d   :  { %v2220_v22 = vmax.f32 %v2163_v18, 0.0  ;;  %v2202_v32 = vadd.f32 %v2201_v21, %v2189_v29 }
 0x21f   :  { %v2239_v23 = vmul.f32 %v2235_v20, %v2220_v22 }
 0x221   :  { %v2242_v24 = vadd.f32 %v2241_v12, %v2239_v23 }
 0x222   :  { %v2164_v25 = vpop.f32.mrf.mxu3 }
 0x224   :  { %v2203_v26 = vpop.f32.mrf.mxu2 }
 0x23a   :  { %v2214_v14 = vpop.f32.mrf.mxu3 }
 0x23b   :  { %v2215_v33 = vadd.f32 %v2214_v14, %v2202_v32 }
 0x23d   :  { %v2221_v36 = vmax.f32 %v2215_v33, 0.0 }
 0x23f   :  { %v2240_v37 = vmul.f32 %v2236_v35, %v2221_v36 }
 0x241   :  { %v2243_v19 = vadd.f32 %v2242_v24, %v2240_v37 }
 0x242   :  { %v2216_v38 = vpop.f32.mrf.mxu3 }
 0x243   :  { %2244 = vadd.xlane.f32.xlu0 %v2243_v19 }
 0x2b6   :  { %v2245_v40 = vpop.xlane.xlu0 %2244 }
 0x2b7   :  { %v2250_v9 = vadd.f32 %v3627_v39, %v2245_v40 }
 0x2b9   :  { %2252 = vst.msk [vmem:[%s3930_s9] sm:$0xff] %vm2251_vm1, %v2250_v9 }
 0x2ba   :  { %2257 = vsyncpa [#allocation4], 1 }
 0x2bb   :  { %2258 = vsyncpa [#allocation6], 1 }

</bundles_post_ra>
